<compile_context>
chip_gen: v7x
topology: tpu7x:2x2x1
jax: 0.10.0
libtpu: 0.0.40
codegen_flags: <defaults>
</compile_context>

<pallas_src>
import jax
import jax.numpy as jnp
from jax.experimental import pallas as pl
from jax.experimental.pallas import tpu as pltpu


def _make_fused_lstm_kernel(n_layer, S, B, B_pad, H, D_max, E, n_hbuf):
    """Fused stacked-LSTM + Linear kernel factory.

    Ref order (single invocation, no grid, all full-array VMEM blocks):
      inputs : x_flat  (S*B_pad, D_max)      time-major, batch/feature padded
               w_lstm  (n_layer, D_max+H+1, 4H)  [w_ih^T ; w_hh^T ; b] per layer
               w_mlp   (H+1, E)                  [w^T ; b]
      outputs: out     (B, E)
      scratch: hbufs   n_hbuf x (S*B_pad, D_max)  inter-layer hidden sequences
    Gate order follows PyTorch: i, f, g, o.
    """
    G = 4 * H

    def kernel(x_ref, w_ref, wm_ref, out_ref, *hbufs):
        # Only needed when D_max > H: the padding columns of hbuf are never
        # written, and 0 * uninitialized-VMEM could poison the next layer.
        if D_max > H:
            for hb in hbufs:
                hb[...] = jnp.zeros_like(hb)

        seq = x_ref[...]                                   # (S*B_pad, D_max)
        h = None
        for l in range(n_layer):
            w_l = w_ref[l]                                 # (D_max+H+1, 4H)
            wih = w_l[0:D_max, :]                          # (D_max, 4H)
            whh = w_l[D_max:D_max + H, :]                  # (H, 4H)
            b = w_l[D_max + H:D_max + H + 1, :]            # (1, 4H)

            # Hoisted input projection for ALL timesteps: one MXU matmul with
            # M = S*B_pad; bias (b_ih + b_hh) folded into its epilogue.
            gih = jnp.dot(seq, wih,
                          preferred_element_type=jnp.float32) + b  # (S*B_pad,4H)

            h = jnp.zeros((B_pad, H), jnp.float32)
            c = jnp.zeros((B_pad, H), jnp.float32)
            last = l == n_layer - 1
            wbuf = None if last else hbufs[(l % 2) if n_hbuf == 2 else 0]

            # Statically unrolled recurrence: only the small recurrent matmul
            # + 3 whole-vreg transcendentals remain on the serial path.
            for t in range(S):
                gates = gih[t * B_pad:(t + 1) * B_pad, :] + jnp.dot(
                    h, whh, preferred_element_type=jnp.float32)   # (B_pad, 4H)
                sig = jax.nn.sigmoid(gates)        # one EUP pass, all 4 gates
                tnh = jnp.tanh(gates)              # one EUP pass, all 4 gates
                i_g = sig[:, 0 * H:1 * H]
                f_g = sig[:, 1 * H:2 * H]
                g_g = tnh[:, 2 * H:3 * H]
                o_g = sig[:, 3 * H:4 * H]
                c = f_g * c + i_g * g_g
                h = o_g * jnp.tanh(c)
                if not last:
                    # Aligned whole-tile store (B_pad = 8 sublanes).
                    if D_max == H:
                        wbuf[pl.ds(t * B_pad, B_pad), :] = h
                    else:
                        wbuf[pl.ds(t * B_pad, B_pad), 0:H] = h
            if not last:
                seq = wbuf[...]                    # (S*B_pad, D_max), VMEM only

        # hn of the last layer -> fused Linear head. Only HBM write.
        head = wm_ref[...]                                 # (H+1, E)
        out = jnp.dot(h, head[0:H, :],
                      preferred_element_type=jnp.float32) + head[H:H + 1, :]
        out_ref[...] = out[:B, :].astype(out_ref.dtype)

    return kernel


def pack_params(params):
    """One-time repack of PyTorch-layout LSTM/Linear weights for the kernel.

    Returns:
      w_lstm: (n_layer, D_max+H+1, 4H) -- per layer [w_ih^T (zero-padded to
              D_max rows) ; w_hh^T ; b_ih + b_hh]
      w_mlp : (H+1, E)                 -- [w^T ; b]
    """
    n_layer = len(params["lstm"])
    H = params["lstm"][0]["w_hh"].shape[1]
    din0 = params["lstm"][0]["w_ih"].shape[1]
    D_max = max(din0, H)
    blocks = []
    for lp in params["lstm"]:
        d_in = lp["w_ih"].shape[1]
        wih_t = jnp.zeros((D_max, 4 * H), jnp.float32)
        wih_t = wih_t.at[:d_in, :].set(lp["w_ih"].T.astype(jnp.float32))
        whh_t = lp["w_hh"].T.astype(jnp.float32)
        b = (lp["b_ih"] + lp["b_hh"]).reshape(1, 4 * H).astype(jnp.float32)
        blocks.append(jnp.concatenate([wih_t, whh_t, b], axis=0))
    w_lstm = jnp.stack(blocks, axis=0)
    w_mlp = jnp.concatenate(
        [params["mlp"]["w"].T.astype(jnp.float32),
         params["mlp"]["b"].reshape(1, -1).astype(jnp.float32)], axis=0)
    return w_lstm, w_mlp


@jax.jit
def simple_lstm_forward(x, w_lstm, w_mlp):
    """x: (batch, seq, in_dim) -> (batch, emb_size).

    Matches SimpleLSTM.forward (torch's .squeeze() is a no-op for batch > 1,
    hidden_dim > 1).
    """
    B, S, Din = x.shape
    n_layer, w_rows, G = w_lstm.shape
    H = G // 4
    D_max = w_rows - H - 1
    E = w_mlp.shape[1]
    B_pad = ((B + 7) // 8) * 8            # f32 sublane granularity

    # Single fused prep op: time-major transpose + batch/feature zero-pad.
    # Row t*B_pad + b  <->  x[b, t, :]; all further movement is one DMA.
    xt = jnp.transpose(x.astype(jnp.float32), (1, 0, 2))        # (S, B, Din)
    x_flat = jnp.pad(
        xt, ((0, 0), (0, B_pad - B), (0, D_max - Din))).reshape(S * B_pad,
                                                                D_max)

    n_hbuf = 0 if n_layer == 1 else (1 if n_layer == 2 else 2)
    scratch = [pltpu.VMEM((S * B_pad, D_max), jnp.float32)] * n_hbuf

    flops = n_layer * (2 * S * B_pad * D_max * G + 2 * S * B_pad * H * G) \
        + 2 * B_pad * H * E
    transcendentals = n_layer * S * B_pad * 9 * H
    bytes_accessed = 4 * (x_flat.size + w_lstm.size + w_mlp.size + B * E)

    return pl.pallas_call(
        _make_fused_lstm_kernel(n_layer, S, B, B_pad, H, D_max, E, n_hbuf),
        out_shape=jax.ShapeDtypeStruct((B, E), jnp.float32),
        in_specs=[
            pl.BlockSpec((S * B_pad, D_max), lambda: (0, 0)),
            pl.BlockSpec((n_layer, w_rows, G), lambda: (0, 0, 0)),
            pl.BlockSpec((H + 1, E), lambda: (0, 0)),
        ],
        out_specs=pl.BlockSpec((B, E), lambda: (0, 0)),
        scratch_shapes=scratch,
        compiler_params=pltpu.CompilerParams(
            vmem_limit_bytes=32 * 1024 * 1024),
        cost_estimate=pl.CostEstimate(flops=flops,
                                      transcendentals=transcendentals,
                                      bytes_accessed=bytes_accessed),
    )(x_flat, w_lstm, w_mlp)


def init_params(key, in_dim, hidden_dim, n_layer, emb_size):
    """Deterministic synthetic params, same shapes/layout as torch.nn.LSTM."""
    params = {"lstm": [], "mlp": {}}
    k = 1.0 / jnp.sqrt(hidden_dim)
    for layer in range(n_layer):
        d_in = in_dim if layer == 0 else hidden_dim
        key, k1, k2, k3, k4 = jax.random.split(key, 5)
        params["lstm"].append({
            "w_ih": jax.random.uniform(k1, (4 * hidden_dim, d_in),
                                       jnp.float32, -k, k),
            "w_hh": jax.random.uniform(k2, (4 * hidden_dim, hidden_dim),
                                       jnp.float32, -k, k),
            "b_ih": jax.random.uniform(k3, (4 * hidden_dim,),
                                       jnp.float32, -k, k),
            "b_hh": jax.random.uniform(k4, (4 * hidden_dim,),
                                       jnp.float32, -k, k),
        })
    key, k1, k2 = jax.random.split(key, 3)
    km = 1.0 / jnp.sqrt(hidden_dim)
    params["mlp"]["w"] = jax.random.uniform(k1, (emb_size, hidden_dim),
                                            jnp.float32, -km, km)
    params["mlp"]["b"] = jax.random.uniform(k2, (emb_size,),
                                            jnp.float32, -km, km)
    return params


def _reference_forward(x, params):
    """Pure-jnp (lax.scan) reference with identical PyTorch LSTM semantics."""
    B = x.shape[0]
    seq = jnp.transpose(x.astype(jnp.float32), (1, 0, 2))    # (S, B, Din)
    h_n = None
    for lp in params["lstm"]:
        H = lp["w_hh"].shape[1]
        w_ih_t, w_hh_t = lp["w_ih"].T, lp["w_hh"].T
        b = lp["b_ih"] + lp["b_hh"]

        def step(carry, x_t, w_ih_t=w_ih_t, w_hh_t=w_hh_t, b=b, H=H):
            h, c = carry
            g = x_t @ w_ih_t + h @ w_hh_t + b
            i = jax.nn.sigmoid(g[:, 0 * H:1 * H])
            f = jax.nn.sigmoid(g[:, 1 * H:2 * H])
            gg = jnp.tanh(g[:, 2 * H:3 * H])
            o = jax.nn.sigmoid(g[:, 3 * H:4 * H])
            c = f * c + i * gg
            h = o * jnp.tanh(c)
            return (h, c), h

        init = (jnp.zeros((B, H), jnp.float32), jnp.zeros((B, H), jnp.float32))
        (h_n, _), hs = jax.lax.scan(step, init, seq)
        seq = hs
    return h_n @ params["mlp"]["w"].T + params["mlp"]["b"]


if __name__ == "__main__":
    in_dim, hidden_dim, n_layer, emb_size = 16, 32, 2, 8
    batch, seq_len = 2, 8

    key = jax.random.PRNGKey(0)
    kx, kp = jax.random.split(key)
    x = jax.random.normal(kx, (batch, seq_len, in_dim), jnp.float32)
    params = init_params(kp, in_dim, hidden_dim, n_layer, emb_size)

    # One-time weight repack -> the per-call graph is just one x-prep fusion
    # plus the fused kernel (3 input DMAs, 1 output DMA).
    w_lstm, w_mlp = pack_params(params)

    out = simple_lstm_forward(x, w_lstm, w_mlp)
    jax.block_until_ready(out)
    assert out.shape == (batch, emb_size)

    ref = _reference_forward(x, params)
    max_err = float(jnp.max(jnp.abs(out - ref)))
    assert jnp.allclose(out, ref, atol=2e-4, rtol=2e-4), max_err

    print("KERNEL_OK")
</pallas_src>

<mosaic_0001>
module attributes {stable_mosaic.version = 11 : i64} {
  func.func @kernel(%arg0: memref<64x32xf32, #tpu.memory_space<vmem>>, %arg1: memref<2x65x128xf32, #tpu.memory_space<vmem>>, %arg2: memref<33x8xf32, #tpu.memory_space<vmem>>, %arg3: memref<2x8xf32, #tpu.memory_space<vmem>>, %arg4: memref<64x32xf32, #tpu.memory_space<vmem>>) attributes {dimension_semantics = [], scalar_prefetch = 0 : i64, scratch_operands = 1 : i64, tpu.core_type = #tpu.core_type<tc>} {
    %c0 = arith.constant 0 : index
    %c0_0 = arith.constant 0 : index
    %0 = vector.load %arg0[%c0, %c0_0] : memref<64x32xf32, #tpu.memory_space<vmem>>, vector<64x32xf32>
    %c0_1 = arith.constant 0 : index
    %c0_2 = arith.constant 0 : index
    %c0_3 = arith.constant 0 : index
    %1 = vector.load %arg1[%c0_1, %c0_2, %c0_3] : memref<2x65x128xf32, #tpu.memory_space<vmem>>, vector<1x65x128xf32>
    %2 = vector.shape_cast %1 : vector<1x65x128xf32> to vector<65x128xf32>
    %3 = vector.extract_strided_slice %2 {offsets = [0, 0], sizes = [32, 128], strides = [1, 1]} : vector<65x128xf32> to vector<32x128xf32>
    %4 = vector.extract_strided_slice %2 {offsets = [32, 0], sizes = [32, 128], strides = [1, 1]} : vector<65x128xf32> to vector<32x128xf32>
    %5 = vector.extract_strided_slice %2 {offsets = [64, 0], sizes = [1, 128], strides = [1, 1]} : vector<65x128xf32> to vector<1x128xf32>
    %cst = arith.constant dense<0.000000e+00> : vector<64x128xf32>
    %6 = tpu.matmul %0, %3, %cst {dimension_numbers = #tpu.dot_dimension_numbers<[1], [0], [0], [1], [0, 0, 1, 1], [], []>} : vector<64x32xf32>, vector<32x128xf32>, vector<64x128xf32> -> vector<64x128xf32>
    %7 = vector.broadcast %5 : vector<1x128xf32> to vector<64x128xf32>
    %8 = arith.addf %6, %7 : vector<64x128xf32>
    %cst_4 = arith.constant 0.000000e+00 : f32
    %9 = vector.broadcast %cst_4 : f32 to vector<8x32xf32>
    %cst_5 = arith.constant 0.000000e+00 : f32
    %10 = vector.broadcast %cst_5 : f32 to vector<8x32xf32>
    %11 = vector.extract_strided_slice %8 {offsets = [0, 0], sizes = [8, 128], strides = [1, 1]} : vector<64x128xf32> to vector<8x128xf32>
    %cst_6 = arith.constant dense<0.000000e+00> : vector<8x128xf32>
    %12 = tpu.matmul %9, %4, %cst_6 {dimension_numbers = #tpu.dot_dimension_numbers<[1], [0], [0], [1], [0, 0, 1, 1], [], []>} : vector<8x32xf32>, vector<32x128xf32>, vector<8x128xf32> -> vector<8x128xf32>
    %13 = arith.addf %11, %12 : vector<8x128xf32>
    %14 = arith.negf %13 : vector<8x128xf32>
    %15 = math.exp %14 : vector<8x128xf32>
    %cst_7 = arith.constant 1.000000e+00 : f32
    %16 = vector.broadcast %cst_7 : f32 to vector<8x128xf32>
    %17 = arith.addf %16, %15 : vector<8x128xf32>
    %18 = arith.divf %16, %17 : vector<8x128xf32>
    %19 = math.tanh %13 : vector<8x128xf32>
    %20 = vector.extract_strided_slice %18 {offsets = [0, 0], sizes = [8, 32], strides = [1, 1]} : vector<8x128xf32> to vector<8x32xf32>
    %21 = vector.extract_strided_slice %18 {offsets = [0, 32], sizes = [8, 32], strides = [1, 1]} : vector<8x128xf32> to vector<8x32xf32>
    %22 = vector.extract_strided_slice %19 {offsets = [0, 64], sizes = [8, 32], strides = [1, 1]} : vector<8x128xf32> to vector<8x32xf32>
    %23 = vector.extract_strided_slice %18 {offsets = [0, 96], sizes = [8, 32], strides = [1, 1]} : vector<8x128xf32> to vector<8x32xf32>
    %24 = arith.mulf %21, %10 : vector<8x32xf32>
    %25 = arith.mulf %20, %22 : vector<8x32xf32>
    %26 = arith.addf %24, %25 : vector<8x32xf32>
    %27 = math.tanh %26 : vector<8x32xf32>
    %28 = arith.mulf %23, %27 : vector<8x32xf32>
    %c0_8 = arith.constant 0 : index
    %c0_9 = arith.constant 0 : index
    %29 = vector.load %arg4[%c0_8, %c0_9] : memref<64x32xf32, #tpu.memory_space<vmem>>, vector<8x32xf32>
    tpu.vector_store %arg4[%c0_8, %c0_9], %28 {strides = array<i32>} : memref<64x32xf32, #tpu.memory_space<vmem>>, vector<8x32xf32>,
    %30 = vector.extract_strided_slice %8 {offsets = [8, 0], sizes = [8, 128], strides = [1, 1]} : vector<64x128xf32> to vector<8x128xf32>
    %cst_10 = arith.constant dense<0.000000e+00> : vector<8x128xf32>
    %31 = tpu.matmul %28, %4, %cst_10 {dimension_numbers = #tpu.dot_dimension_numbers<[1], [0], [0], [1], [0, 0, 1, 1], [], []>} : vector<8x32xf32>, vector<32x128xf32>, vector<8x128xf32> -> vector<8x128xf32>
    %32 = arith.addf %30, %31 : vector<8x128xf32>
    %33 = arith.negf %32 : vector<8x128xf32>
    %34 = math.exp %33 : vector<8x128xf32>
    %cst_11 = arith.constant 1.000000e+00 : f32
    %35 = vector.broadcast %cst_11 : f32 to vector<8x128xf32>
    %36 = arith.addf %35, %34 : vector<8x128xf32>
    %37 = arith.divf %35, %36 : vector<8x128xf32>
    %38 = math.tanh %32 : vector<8x128xf32>
    %39 = vector.extract_strided_slice %37 {offsets = [0, 0], sizes = [8, 32], strides = [1, 1]} : vector<8x128xf32> to vector<8x32xf32>
    %40 = vector.extract_strided_slice %37 {offsets = [0, 32], sizes = [8, 32], strides = [1, 1]} : vector<8x128xf32> to vector<8x32xf32>
    %41 = vector.extract_strided_slice %38 {offsets = [0, 64], sizes = [8, 32], strides = [1, 1]} : vector<8x128xf32> to vector<8x32xf32>
    %42 = vector.extract_strided_slice %37 {offsets = [0, 96], sizes = [8, 32], strides = [1, 1]} : vector<8x128xf32> to vector<8x32xf32>
    %43 = arith.mulf %40, %26 : vector<8x32xf32>
    %44 = arith.mulf %39, %41 : vector<8x32xf32>
    %45 = arith.addf %43, %44 : vector<8x32xf32>
    %46 = math.tanh %45 : vector<8x32xf32>
    %47 = arith.mulf %42, %46 : vector<8x32xf32>
    %c8 = arith.constant 8 : index
    %c0_12 = arith.constant 0 : index
    %48 = vector.load %arg4[%c8, %c0_12] : memref<64x32xf32, #tpu.memory_space<vmem>>, vector<8x32xf32>
    tpu.vector_store %arg4[%c8, %c0_12], %47 {strides = array<i32>} : memref<64x32xf32, #tpu.memory_space<vmem>>, vector<8x32xf32>,
    %49 = vector.extract_strided_slice %8 {offsets = [16, 0], sizes = [8, 128], strides = [1, 1]} : vector<64x128xf32> to vector<8x128xf32>
    %cst_13 = arith.constant dense<0.000000e+00> : vector<8x128xf32>
    %50 = tpu.matmul %47, %4, %cst_13 {dimension_numbers = #tpu.dot_dimension_numbers<[1], [0], [0], [1], [0, 0, 1, 1], [], []>} : vector<8x32xf32>, vector<32x128xf32>, vector<8x128xf32> -> vector<8x128xf32>
    %51 = arith.addf %49, %50 : vector<8x128xf32>
    %52 = arith.negf %51 : vector<8x128xf32>
    %53 = math.exp %52 : vector<8x128xf32>
    %cst_14 = arith.constant 1.000000e+00 : f32
    %54 = vector.broadcast %cst_14 : f32 to vector<8x128xf32>
    %55 = arith.addf %54, %53 : vector<8x128xf32>
    %56 = arith.divf %54, %55 : vector<8x128xf32>
    %57 = math.tanh %51 : vector<8x128xf32>
    %58 = vector.extract_strided_slice %56 {offsets = [0, 0], sizes = [8, 32], strides = [1, 1]} : vector<8x128xf32> to vector<8x32xf32>
    %59 = vector.extract_strided_slice %56 {offsets = [0, 32], sizes = [8, 32], strides = [1, 1]} : vector<8x128xf32> to vector<8x32xf32>
    %60 = vector.extract_strided_slice %57 {offsets = [0, 64], sizes = [8, 32], strides = [1, 1]} : vector<8x128xf32> to vector<8x32xf32>
    %61 = vector.extract_strided_slice %56 {offsets = [0, 96], sizes = [8, 32], strides = [1, 1]} : vector<8x128xf32> to vector<8x32xf32>
    %62 = arith.mulf %59, %45 : vector<8x32xf32>
    %63 = arith.mulf %58, %60 : vector<8x32xf32>
    %64 = arith.addf %62, %63 : vector<8x32xf32>
    %65 = math.tanh %64 : vector<8x32xf32>
    %66 = arith.mulf %61, %65 : vector<8x32xf32>
    %c16 = arith.constant 16 : index
    %c0_15 = arith.constant 0 : index
    %67 = vector.load %arg4[%c16, %c0_15] : memref<64x32xf32, #tpu.memory_space<vmem>>, vector<8x32xf32>
    tpu.vector_store %arg4[%c16, %c0_15], %66 {strides = array<i32>} : memref<64x32xf32, #tpu.memory_space<vmem>>, vector<8x32xf32>,
    %68 = vector.extract_strided_slice %8 {offsets = [24, 0], sizes = [8, 128], strides = [1, 1]} : vector<64x128xf32> to vector<8x128xf32>
    %cst_16 = arith.constant dense<0.000000e+00> : vector<8x128xf32>
    %69 = tpu.matmul %66, %4, %cst_16 {dimension_numbers = #tpu.dot_dimension_numbers<[1], [0], [0], [1], [0, 0, 1, 1], [], []>} : vector<8x32xf32>, vector<32x128xf32>, vector<8x128xf32> -> vector<8x128xf32>
    %70 = arith.addf %68, %69 : vector<8x128xf32>
    %71 = arith.negf %70 : vector<8x128xf32>
    %72 = math.exp %71 : vector<8x128xf32>
    %cst_17 = arith.constant 1.000000e+00 : f32
    %73 = vector.broadcast %cst_17 : f32 to vector<8x128xf32>
    %74 = arith.addf %73, %72 : vector<8x128xf32>
    %75 = arith.divf %73, %74 : vector<8x128xf32>
    %76 = math.tanh %70 : vector<8x128xf32>
    %77 = vector.extract_strided_slice %75 {offsets = [0, 0], sizes = [8, 32], strides = [1, 1]} : vector<8x128xf32> to vector<8x32xf32>
    %78 = vector.extract_strided_slice %75 {offsets = [0, 32], sizes = [8, 32], strides = [1, 1]} : vector<8x128xf32> to vector<8x32xf32>
    %79 = vector.extract_strided_slice %76 {offsets = [0, 64], sizes = [8, 32], strides = [1, 1]} : vector<8x128xf32> to vector<8x32xf32>
    %80 = vector.extract_strided_slice %75 {offsets = [0, 96], sizes = [8, 32], strides = [1, 1]} : vector<8x128xf32> to vector<8x32xf32>
    %81 = arith.mulf %78, %64 : vector<8x32xf32>
    %82 = arith.mulf %77, %79 : vector<8x32xf32>
    %83 = arith.addf %81, %82 : vector<8x32xf32>
    %84 = math.tanh %83 : vector<8x32xf32>
    %85 = arith.mulf %80, %84 : vector<8x32xf32>
    %c24 = arith.constant 24 : index
    %c0_18 = arith.constant 0 : index
    %86 = vector.load %arg4[%c24, %c0_18] : memref<64x32xf32, #tpu.memory_space<vmem>>, vector<8x32xf32>
    tpu.vector_store %arg4[%c24, %c0_18], %85 {strides = array<i32>} : memref<64x32xf32, #tpu.memory_space<vmem>>, vector<8x32xf32>,
    %87 = vector.extract_strided_slice %8 {offsets = [32, 0], sizes = [8, 128], strides = [1, 1]} : vector<64x128xf32> to vector<8x128xf32>
    %cst_19 = arith.constant dense<0.000000e+00> : vector<8x128xf32>
    %88 = tpu.matmul %85, %4, %cst_19 {dimension_numbers = #tpu.dot_dimension_numbers<[1], [0], [0], [1], [0, 0, 1, 1], [], []>} : vector<8x32xf32>, vector<32x128xf32>, vector<8x128xf32> -> vector<8x128xf32>
    %89 = arith.addf %87, %88 : vector<8x128xf32>
    %90 = arith.negf %89 : vector<8x128xf32>
    %91 = math.exp %90 : vector<8x128xf32>
    %cst_20 = arith.constant 1.000000e+00 : f32
    %92 = vector.broadcast %cst_20 : f32 to vector<8x128xf32>
    %93 = arith.addf %92, %91 : vector<8x128xf32>
    %94 = arith.divf %92, %93 : vector<8x128xf32>
    %95 = math.tanh %89 : vector<8x128xf32>
    %96 = vector.extract_strided_slice %94 {offsets = [0, 0], sizes = [8, 32], strides = [1, 1]} : vector<8x128xf32> to vector<8x32xf32>
    %97 = vector.extract_strided_slice %94 {offsets = [0, 32], sizes = [8, 32], strides = [1, 1]} : vector<8x128xf32> to vector<8x32xf32>
    %98 = vector.extract_strided_slice %95 {offsets = [0, 64], sizes = [8, 32], strides = [1, 1]} : vector<8x128xf32> to vector<8x32xf32>
    %99 = vector.extract_strided_slice %94 {offsets = [0, 96], sizes = [8, 32], strides = [1, 1]} : vector<8x128xf32> to vector<8x32xf32>
    %100 = arith.mulf %97, %83 : vector<8x32xf32>
    %101 = arith.mulf %96, %98 : vector<8x32xf32>
    %102 = arith.addf %100, %101 : vector<8x32xf32>
    %103 = math.tanh %102 : vector<8x32xf32>
    %104 = arith.mulf %99, %103 : vector<8x32xf32>
    %c32 = arith.constant 32 : index
    %c0_21 = arith.constant 0 : index
    %105 = vector.load %arg4[%c32, %c0_21] : memref<64x32xf32, #tpu.memory_space<vmem>>, vector<8x32xf32>
    tpu.vector_store %arg4[%c32, %c0_21], %104 {strides = array<i32>} : memref<64x32xf32, #tpu.memory_space<vmem>>, vector<8x32xf32>,
    %106 = vector.extract_strided_slice %8 {offsets = [40, 0], sizes = [8, 128], strides = [1, 1]} : vector<64x128xf32> to vector<8x128xf32>
    %cst_22 = arith.constant dense<0.000000e+00> : vector<8x128xf32>
    %107 = tpu.matmul %104, %4, %cst_22 {dimension_numbers = #tpu.dot_dimension_numbers<[1], [0], [0], [1], [0, 0, 1, 1], [], []>} : vector<8x32xf32>, vector<32x128xf32>, vector<8x128xf32> -> vector<8x128xf32>
    %108 = arith.addf %106, %107 : vector<8x128xf32>
    %109 = arith.negf %108 : vector<8x128xf32>
    %110 = math.exp %109 : vector<8x128xf32>
    %cst_23 = arith.constant 1.000000e+00 : f32
    %111 = vector.broadcast %cst_23 : f32 to vector<8x128xf32>
    %112 = arith.addf %111, %110 : vector<8x128xf32>
    %113 = arith.divf %111, %112 : vector<8x128xf32>
    %114 = math.tanh %108 : vector<8x128xf32>
    %115 = vector.extract_strided_slice %113 {offsets = [0, 0], sizes = [8, 32], strides = [1, 1]} : vector<8x128xf32> to vector<8x32xf32>
    %116 = vector.extract_strided_slice %113 {offsets = [0, 32], sizes = [8, 32], strides = [1, 1]} : vector<8x128xf32> to vector<8x32xf32>
    %117 = vector.extract_strided_slice %114 {offsets = [0, 64], sizes = [8, 32], strides = [1, 1]} : vector<8x128xf32> to vector<8x32xf32>
    %118 = vector.extract_strided_slice %113 {offsets = [0, 96], sizes = [8, 32], strides = [1, 1]} : vector<8x128xf32> to vector<8x32xf32>
    %119 = arith.mulf %116, %102 : vector<8x32xf32>
    %120 = arith.mulf %115, %117 : vector<8x32xf32>
    %121 = arith.addf %119, %120 : vector<8x32xf32>
    %122 = math.tanh %121 : vector<8x32xf32>
    %123 = arith.mulf %118, %122 : vector<8x32xf32>
    %c40 = arith.constant 40 : index
    %c0_24 = arith.constant 0 : index
    %124 = vector.load %arg4[%c40, %c0_24] : memref<64x32xf32, #tpu.memory_space<vmem>>, vector<8x32xf32>
    tpu.vector_store %arg4[%c40, %c0_24], %123 {strides = array<i32>} : memref<64x32xf32, #tpu.memory_space<vmem>>, vector<8x32xf32>,
    %125 = vector.extract_strided_slice %8 {offsets = [48, 0], sizes = [8, 128], strides = [1, 1]} : vector<64x128xf32> to vector<8x128xf32>
    %cst_25 = arith.constant dense<0.000000e+00> : vector<8x128xf32>
    %126 = tpu.matmul %123, %4, %cst_25 {dimension_numbers = #tpu.dot_dimension_numbers<[1], [0], [0], [1], [0, 0, 1, 1], [], []>} : vector<8x32xf32>, vector<32x128xf32>, vector<8x128xf32> -> vector<8x128xf32>
    %127 = arith.addf %125, %126 : vector<8x128xf32>
    %128 = arith.negf %127 : vector<8x128xf32>
    %129 = math.exp %128 : vector<8x128xf32>
    %cst_26 = arith.constant 1.000000e+00 : f32
    %130 = vector.broadcast %cst_26 : f32 to vector<8x128xf32>
    %131 = arith.addf %130, %129 : vector<8x128xf32>
    %132 = arith.divf %130, %131 : vector<8x128xf32>
    %133 = math.tanh %127 : vector<8x128xf32>
    %134 = vector.extract_strided_slice %132 {offsets = [0, 0], sizes = [8, 32], strides = [1, 1]} : vector<8x128xf32> to vector<8x32xf32>
    %135 = vector.extract_strided_slice %132 {offsets = [0, 32], sizes = [8, 32], strides = [1, 1]} : vector<8x128xf32> to vector<8x32xf32>
    %136 = vector.extract_strided_slice %133 {offsets = [0, 64], sizes = [8, 32], strides = [1, 1]} : vector<8x128xf32> to vector<8x32xf32>
    %137 = vector.extract_strided_slice %132 {offsets = [0, 96], sizes = [8, 32], strides = [1, 1]} : vector<8x128xf32> to vector<8x32xf32>
    %138 = arith.mulf %135, %121 : vector<8x32xf32>
    %139 = arith.mulf %134, %136 : vector<8x32xf32>
    %140 = arith.addf %138, %139 : vector<8x32xf32>
    %141 = math.tanh %140 : vector<8x32xf32>
    %142 = arith.mulf %137, %141 : vector<8x32xf32>
    %c48 = arith.constant 48 : index
    %c0_27 = arith.constant 0 : index
    %143 = vector.load %arg4[%c48, %c0_27] : memref<64x32xf32, #tpu.memory_space<vmem>>, vector<8x32xf32>
    tpu.vector_store %arg4[%c48, %c0_27], %142 {strides = array<i32>} : memref<64x32xf32, #tpu.memory_space<vmem>>, vector<8x32xf32>,
    %144 = vector.extract_strided_slice %8 {offsets = [56, 0], sizes = [8, 128], strides = [1, 1]} : vector<64x128xf32> to vector<8x128xf32>
    %cst_28 = arith.constant dense<0.000000e+00> : vector<8x128xf32>
    %145 = tpu.matmul %142, %4, %cst_28 {dimension_numbers = #tpu.dot_dimension_numbers<[1], [0], [0], [1], [0, 0, 1, 1], [], []>} : vector<8x32xf32>, vector<32x128xf32>, vector<8x128xf32> -> vector<8x128xf32>
    %146 = arith.addf %144, %145 : vector<8x128xf32>
    %147 = arith.negf %146 : vector<8x128xf32>
    %148 = math.exp %147 : vector<8x128xf32>
    %cst_29 = arith.constant 1.000000e+00 : f32
    %149 = vector.broadcast %cst_29 : f32 to vector<8x128xf32>
    %150 = arith.addf %149, %148 : vector<8x128xf32>
    %151 = arith.divf %149, %150 : vector<8x128xf32>
    %152 = math.tanh %146 : vector<8x128xf32>
    %153 = vector.extract_strided_slice %151 {offsets = [0, 0], sizes = [8, 32], strides = [1, 1]} : vector<8x128xf32> to vector<8x32xf32>
    %154 = vector.extract_strided_slice %151 {offsets = [0, 32], sizes = [8, 32], strides = [1, 1]} : vector<8x128xf32> to vector<8x32xf32>
    %155 = vector.extract_strided_slice %152 {offsets = [0, 64], sizes = [8, 32], strides = [1, 1]} : vector<8x128xf32> to vector<8x32xf32>
    %156 = vector.extract_strided_slice %151 {offsets = [0, 96], sizes = [8, 32], strides = [1, 1]} : vector<8x128xf32> to vector<8x32xf32>
    %157 = arith.mulf %154, %140 : vector<8x32xf32>
    %158 = arith.mulf %153, %155 : vector<8x32xf32>
    %159 = arith.addf %157, %158 : vector<8x32xf32>
    %160 = math.tanh %159 : vector<8x32xf32>
    %161 = arith.mulf %156, %160 : vector<8x32xf32>
    %c56 = arith.constant 56 : index
    %c0_30 = arith.constant 0 : index
    %162 = vector.load %arg4[%c56, %c0_30] : memref<64x32xf32, #tpu.memory_space<vmem>>, vector<8x32xf32>
    tpu.vector_store %arg4[%c56, %c0_30], %161 {strides = array<i32>} : memref<64x32xf32, #tpu.memory_space<vmem>>, vector<8x32xf32>,
    %c0_31 = arith.constant 0 : index
    %c0_32 = arith.constant 0 : index
    %163 = vector.load %arg4[%c0_31, %c0_32] : memref<64x32xf32, #tpu.memory_space<vmem>>, vector<64x32xf32>
    %c1 = arith.constant 1 : index
    %c0_33 = arith.constant 0 : index
    %c0_34 = arith.constant 0 : index
    %164 = vector.load %arg1[%c1, %c0_33, %c0_34] : memref<2x65x128xf32, #tpu.memory_space<vmem>>, vector<1x65x128xf32>
    %165 = vector.shape_cast %164 : vector<1x65x128xf32> to vector<65x128xf32>
    %166 = vector.extract_strided_slice %165 {offsets = [0, 0], sizes = [32, 128], strides = [1, 1]} : vector<65x128xf32> to vector<32x128xf32>
    %167 = vector.extract_strided_slice %165 {offsets = [32, 0], sizes = [32, 128], strides = [1, 1]} : vector<65x128xf32> to vector<32x128xf32>
    %168 = vector.extract_strided_slice %165 {offsets = [64, 0], sizes = [1, 128], strides = [1, 1]} : vector<65x128xf32> to vector<1x128xf32>
    %cst_35 = arith.constant dense<0.000000e+00> : vector<64x128xf32>
    %169 = tpu.matmul %163, %166, %cst_35 {dimension_numbers = #tpu.dot_dimension_numbers<[1], [0], [0], [1], [0, 0, 1, 1], [], []>} : vector<64x32xf32>, vector<32x128xf32>, vector<64x128xf32> -> vector<64x128xf32>
    %170 = vector.broadcast %168 : vector<1x128xf32> to vector<64x128xf32>
    %171 = arith.addf %169, %170 : vector<64x128xf32>
    %cst_36 = arith.constant 0.000000e+00 : f32
    %172 = vector.broadcast %cst_36 : f32 to vector<8x32xf32>
    %cst_37 = arith.constant 0.000000e+00 : f32
    %173 = vector.broadcast %cst_37 : f32 to vector<8x32xf32>
    %174 = vector.extract_strided_slice %171 {offsets = [0, 0], sizes = [8, 128], strides = [1, 1]} : vector<64x128xf32> to vector<8x128xf32>
    %cst_38 = arith.constant dense<0.000000e+00> : vector<8x128xf32>
    %175 = tpu.matmul %172, %167, %cst_38 {dimension_numbers = #tpu.dot_dimension_numbers<[1], [0], [0], [1], [0, 0, 1, 1], [], []>} : vector<8x32xf32>, vector<32x128xf32>, vector<8x128xf32> -> vector<8x128xf32>
    %176 = arith.addf %174, %175 : vector<8x128xf32>
    %177 = arith.negf %176 : vector<8x128xf32>
    %178 = math.exp %177 : vector<8x128xf32>
    %cst_39 = arith.constant 1.000000e+00 : f32
    %179 = vector.broadcast %cst_39 : f32 to vector<8x128xf32>
    %180 = arith.addf %179, %178 : vector<8x128xf32>
    %181 = arith.divf %179, %180 : vector<8x128xf32>
    %182 = math.tanh %176 : vector<8x128xf32>
    %183 = vector.extract_strided_slice %181 {offsets = [0, 0], sizes = [8, 32], strides = [1, 1]} : vector<8x128xf32> to vector<8x32xf32>
    %184 = vector.extract_strided_slice %181 {offsets = [0, 32], sizes = [8, 32], strides = [1, 1]} : vector<8x128xf32> to vector<8x32xf32>
    %185 = vector.extract_strided_slice %182 {offsets = [0, 64], sizes = [8, 32], strides = [1, 1]} : vector<8x128xf32> to vector<8x32xf32>
    %186 = vector.extract_strided_slice %181 {offsets = [0, 96], sizes = [8, 32], strides = [1, 1]} : vector<8x128xf32> to vector<8x32xf32>
    %187 = arith.mulf %184, %173 : vector<8x32xf32>
    %188 = arith.mulf %183, %185 : vector<8x32xf32>
    %189 = arith.addf %187, %188 : vector<8x32xf32>
    %190 = math.tanh %189 : vector<8x32xf32>
    %191 = arith.mulf %186, %190 : vector<8x32xf32>
    %192 = vector.extract_strided_slice %171 {offsets = [8, 0], sizes = [8, 128], strides = [1, 1]} : vector<64x128xf32> to vector<8x128xf32>
    %cst_40 = arith.constant dense<0.000000e+00> : vector<8x128xf32>
    %193 = tpu.matmul %191, %167, %cst_40 {dimension_numbers = #tpu.dot_dimension_numbers<[1], [0], [0], [1], [0, 0, 1, 1], [], []>} : vector<8x32xf32>, vector<32x128xf32>, vector<8x128xf32> -> vector<8x128xf32>
    %194 = arith.addf %192, %193 : vector<8x128xf32>
    %195 = arith.negf %194 : vector<8x128xf32>
    %196 = math.exp %195 : vector<8x128xf32>
    %cst_41 = arith.constant 1.000000e+00 : f32
    %197 = vector.broadcast %cst_41 : f32 to vector<8x128xf32>
    %198 = arith.addf %197, %196 : vector<8x128xf32>
    %199 = arith.divf %197, %198 : vector<8x128xf32>
    %200 = math.tanh %194 : vector<8x128xf32>
    %201 = vector.extract_strided_slice %199 {offsets = [0, 0], sizes = [8, 32], strides = [1, 1]} : vector<8x128xf32> to vector<8x32xf32>
    %202 = vector.extract_strided_slice %199 {offsets = [0, 32], sizes = [8, 32], strides = [1, 1]} : vector<8x128xf32> to vector<8x32xf32>
    %203 = vector.extract_strided_slice %200 {offsets = [0, 64], sizes = [8, 32], strides = [1, 1]} : vector<8x128xf32> to vector<8x32xf32>
    %204 = vector.extract_strided_slice %199 {offsets = [0, 96], sizes = [8, 32], strides = [1, 1]} : vector<8x128xf32> to vector<8x32xf32>
    %205 = arith.mulf %202, %189 : vector<8x32xf32>
    %206 = arith.mulf %201, %203 : vector<8x32xf32>
    %207 = arith.addf %205, %206 : vector<8x32xf32>
    %208 = math.tanh %207 : vector<8x32xf32>
    %209 = arith.mulf %204, %208 : vector<8x32xf32>
    %210 = vector.extract_strided_slice %171 {offsets = [16, 0], sizes = [8, 128], strides = [1, 1]} : vector<64x128xf32> to vector<8x128xf32>
    %cst_42 = arith.constant dense<0.000000e+00> : vector<8x128xf32>
    %211 = tpu.matmul %209, %167, %cst_42 {dimension_numbers = #tpu.dot_dimension_numbers<[1], [0], [0], [1], [0, 0, 1, 1], [], []>} : vector<8x32xf32>, vector<32x128xf32>, vector<8x128xf32> -> vector<8x128xf32>
    %212 = arith.addf %210, %211 : vector<8x128xf32>
    %213 = arith.negf %212 : vector<8x128xf32>
    %214 = math.exp %213 : vector<8x128xf32>
    %cst_43 = arith.constant 1.000000e+00 : f32
    %215 = vector.broadcast %cst_43 : f32 to vector<8x128xf32>
    %216 = arith.addf %215, %214 : vector<8x128xf32>
    %217 = arith.divf %215, %216 : vector<8x128xf32>
    %218 = math.tanh %212 : vector<8x128xf32>
    %219 = vector.extract_strided_slice %217 {offsets = [0, 0], sizes = [8, 32], strides = [1, 1]} : vector<8x128xf32> to vector<8x32xf32>
    %220 = vector.extract_strided_slice %217 {offsets = [0, 32], sizes = [8, 32], strides = [1, 1]} : vector<8x128xf32> to vector<8x32xf32>
    %221 = vector.extract_strided_slice %218 {offsets = [0, 64], sizes = [8, 32], strides = [1, 1]} : vector<8x128xf32> to vector<8x32xf32>
    %222 = vector.extract_strided_slice %217 {offsets = [0, 96], sizes = [8, 32], strides = [1, 1]} : vector<8x128xf32> to vector<8x32xf32>
    %223 = arith.mulf %220, %207 : vector<8x32xf32>
    %224 = arith.mulf %219, %221 : vector<8x32xf32>
    %225 = arith.addf %223, %224 : vector<8x32xf32>
    %226 = math.tanh %225 : vector<8x32xf32>
    %227 = arith.mulf %222, %226 : vector<8x32xf32>
    %228 = vector.extract_strided_slice %171 {offsets = [24, 0], sizes = [8, 128], strides = [1, 1]} : vector<64x128xf32> to vector<8x128xf32>
    %cst_44 = arith.constant dense<0.000000e+00> : vector<8x128xf32>
    %229 = tpu.matmul %227, %167, %cst_44 {dimension_numbers = #tpu.dot_dimension_numbers<[1], [0], [0], [1], [0, 0, 1, 1], [], []>} : vector<8x32xf32>, vector<32x128xf32>, vector<8x128xf32> -> vector<8x128xf32>
    %230 = arith.addf %228, %229 : vector<8x128xf32>
    %231 = arith.negf %230 : vector<8x128xf32>
    %232 = math.exp %231 : vector<8x128xf32>
    %cst_45 = arith.constant 1.000000e+00 : f32
    %233 = vector.broadcast %cst_45 : f32 to vector<8x128xf32>
    %234 = arith.addf %233, %232 : vector<8x128xf32>
    %235 = arith.divf %233, %234 : vector<8x128xf32>
    %236 = math.tanh %230 : vector<8x128xf32>
    %237 = vector.extract_strided_slice %235 {offsets = [0, 0], sizes = [8, 32], strides = [1, 1]} : vector<8x128xf32> to vector<8x32xf32>
    %238 = vector.extract_strided_slice %235 {offsets = [0, 32], sizes = [8, 32], strides = [1, 1]} : vector<8x128xf32> to vector<8x32xf32>
    %239 = vector.extract_strided_slice %236 {offsets = [0, 64], sizes = [8, 32], strides = [1, 1]} : vector<8x128xf32> to vector<8x32xf32>
    %240 = vector.extract_strided_slice %235 {offsets = [0, 96], sizes = [8, 32], strides = [1, 1]} : vector<8x128xf32> to vector<8x32xf32>
    %241 = arith.mulf %238, %225 : vector<8x32xf32>
    %242 = arith.mulf %237, %239 : vector<8x32xf32>
    %243 = arith.addf %241, %242 : vector<8x32xf32>
    %244 = math.tanh %243 : vector<8x32xf32>
    %245 = arith.mulf %240, %244 : vector<8x32xf32>
    %246 = vector.extract_strided_slice %171 {offsets = [32, 0], sizes = [8, 128], strides = [1, 1]} : vector<64x128xf32> to vector<8x128xf32>
    %cst_46 = arith.constant dense<0.000000e+00> : vector<8x128xf32>
    %247 = tpu.matmul %245, %167, %cst_46 {dimension_numbers = #tpu.dot_dimension_numbers<[1], [0], [0], [1], [0, 0, 1, 1], [], []>} : vector<8x32xf32>, vector<32x128xf32>, vector<8x128xf32> -> vector<8x128xf32>
    %248 = arith.addf %246, %247 : vector<8x128xf32>
    %249 = arith.negf %248 : vector<8x128xf32>
    %250 = math.exp %249 : vector<8x128xf32>
    %cst_47 = arith.constant 1.000000e+00 : f32
    %251 = vector.broadcast %cst_47 : f32 to vector<8x128xf32>
    %252 = arith.addf %251, %250 : vector<8x128xf32>
    %253 = arith.divf %251, %252 : vector<8x128xf32>
    %254 = math.tanh %248 : vector<8x128xf32>
    %255 = vector.extract_strided_slice %253 {offsets = [0, 0], sizes = [8, 32], strides = [1, 1]} : vector<8x128xf32> to vector<8x32xf32>
    %256 = vector.extract_strided_slice %253 {offsets = [0, 32], sizes = [8, 32], strides = [1, 1]} : vector<8x128xf32> to vector<8x32xf32>
    %257 = vector.extract_strided_slice %254 {offsets = [0, 64], sizes = [8, 32], strides = [1, 1]} : vector<8x128xf32> to vector<8x32xf32>
    %258 = vector.extract_strided_slice %253 {offsets = [0, 96], sizes = [8, 32], strides = [1, 1]} : vector<8x128xf32> to vector<8x32xf32>
    %259 = arith.mulf %256, %243 : vector<8x32xf32>
    %260 = arith.mulf %255, %257 : vector<8x32xf32>
    %261 = arith.addf %259, %260 : vector<8x32xf32>
    %262 = math.tanh %261 : vector<8x32xf32>
    %263 = arith.mulf %258, %262 : vector<8x32xf32>
    %264 = vector.extract_strided_slice %171 {offsets = [40, 0], sizes = [8, 128], strides = [1, 1]} : vector<64x128xf32> to vector<8x128xf32>
    %cst_48 = arith.constant dense<0.000000e+00> : vector<8x128xf32>
    %265 = tpu.matmul %263, %167, %cst_48 {dimension_numbers = #tpu.dot_dimension_numbers<[1], [0], [0], [1], [0, 0, 1, 1], [], []>} : vector<8x32xf32>, vector<32x128xf32>, vector<8x128xf32> -> vector<8x128xf32>
    %266 = arith.addf %264, %265 : vector<8x128xf32>
    %267 = arith.negf %266 : vector<8x128xf32>
    %268 = math.exp %267 : vector<8x128xf32>
    %cst_49 = arith.constant 1.000000e+00 : f32
    %269 = vector.broadcast %cst_49 : f32 to vector<8x128xf32>
    %270 = arith.addf %269, %268 : vector<8x128xf32>
    %271 = arith.divf %269, %270 : vector<8x128xf32>
    %272 = math.tanh %266 : vector<8x128xf32>
    %273 = vector.extract_strided_slice %271 {offsets = [0, 0], sizes = [8, 32], strides = [1, 1]} : vector<8x128xf32> to vector<8x32xf32>
    %274 = vector.extract_strided_slice %271 {offsets = [0, 32], sizes = [8, 32], strides = [1, 1]} : vector<8x128xf32> to vector<8x32xf32>
    %275 = vector.extract_strided_slice %272 {offsets = [0, 64], sizes = [8, 32], strides = [1, 1]} : vector<8x128xf32> to vector<8x32xf32>
    %276 = vector.extract_strided_slice %271 {offsets = [0, 96], sizes = [8, 32], strides = [1, 1]} : vector<8x128xf32> to vector<8x32xf32>
    %277 = arith.mulf %274, %261 : vector<8x32xf32>
    %278 = arith.mulf %273, %275 : vector<8x32xf32>
    %279 = arith.addf %277, %278 : vector<8x32xf32>
    %280 = math.tanh %279 : vector<8x32xf32>
    %281 = arith.mulf %276, %280 : vector<8x32xf32>
    %282 = vector.extract_strided_slice %171 {offsets = [48, 0], sizes = [8, 128], strides = [1, 1]} : vector<64x128xf32> to vector<8x128xf32>
    %cst_50 = arith.constant dense<0.000000e+00> : vector<8x128xf32>
    %283 = tpu.matmul %281, %167, %cst_50 {dimension_numbers = #tpu.dot_dimension_numbers<[1], [0], [0], [1], [0, 0, 1, 1], [], []>} : vector<8x32xf32>, vector<32x128xf32>, vector<8x128xf32> -> vector<8x128xf32>
    %284 = arith.addf %282, %283 : vector<8x128xf32>
    %285 = arith.negf %284 : vector<8x128xf32>
    %286 = math.exp %285 : vector<8x128xf32>
    %cst_51 = arith.constant 1.000000e+00 : f32
    %287 = vector.broadcast %cst_51 : f32 to vector<8x128xf32>
    %288 = arith.addf %287, %286 : vector<8x128xf32>
    %289 = arith.divf %287, %288 : vector<8x128xf32>
    %290 = math.tanh %284 : vector<8x128xf32>
    %291 = vector.extract_strided_slice %289 {offsets = [0, 0], sizes = [8, 32], strides = [1, 1]} : vector<8x128xf32> to vector<8x32xf32>
    %292 = vector.extract_strided_slice %289 {offsets = [0, 32], sizes = [8, 32], strides = [1, 1]} : vector<8x128xf32> to vector<8x32xf32>
    %293 = vector.extract_strided_slice %290 {offsets = [0, 64], sizes = [8, 32], strides = [1, 1]} : vector<8x128xf32> to vector<8x32xf32>
    %294 = vector.extract_strided_slice %289 {offsets = [0, 96], sizes = [8, 32], strides = [1, 1]} : vector<8x128xf32> to vector<8x32xf32>
    %295 = arith.mulf %292, %279 : vector<8x32xf32>
    %296 = arith.mulf %291, %293 : vector<8x32xf32>
    %297 = arith.addf %295, %296 : vector<8x32xf32>
    %298 = math.tanh %297 : vector<8x32xf32>
    %299 = arith.mulf %294, %298 : vector<8x32xf32>
    %300 = vector.extract_strided_slice %171 {offsets = [56, 0], sizes = [8, 128], strides = [1, 1]} : vector<64x128xf32> to vector<8x128xf32>
    %cst_52 = arith.constant dense<0.000000e+00> : vector<8x128xf32>
    %301 = tpu.matmul %299, %167, %cst_52 {dimension_numbers = #tpu.dot_dimension_numbers<[1], [0], [0], [1], [0, 0, 1, 1], [], []>} : vector<8x32xf32>, vector<32x128xf32>, vector<8x128xf32> -> vector<8x128xf32>
    %302 = arith.addf %300, %301 : vector<8x128xf32>
    %303 = arith.negf %302 : vector<8x128xf32>
    %304 = math.exp %303 : vector<8x128xf32>
    %cst_53 = arith.constant 1.000000e+00 : f32
    %305 = vector.broadcast %cst_53 : f32 to vector<8x128xf32>
    %306 = arith.addf %305, %304 : vector<8x128xf32>
    %307 = arith.divf %305, %306 : vector<8x128xf32>
    %308 = math.tanh %302 : vector<8x128xf32>
    %309 = vector.extract_strided_slice %307 {offsets = [0, 0], sizes = [8, 32], strides = [1, 1]} : vector<8x128xf32> to vector<8x32xf32>
    %310 = vector.extract_strided_slice %307 {offsets = [0, 32], sizes = [8, 32], strides = [1, 1]} : vector<8x128xf32> to vector<8x32xf32>
    %311 = vector.extract_strided_slice %308 {offsets = [0, 64], sizes = [8, 32], strides = [1, 1]} : vector<8x128xf32> to vector<8x32xf32>
    %312 = vector.extract_strided_slice %307 {offsets = [0, 96], sizes = [8, 32], strides = [1, 1]} : vector<8x128xf32> to vector<8x32xf32>
    %313 = arith.mulf %310, %297 : vector<8x32xf32>
    %314 = arith.mulf %309, %311 : vector<8x32xf32>
    %315 = arith.addf %313, %314 : vector<8x32xf32>
    %316 = math.tanh %315 : vector<8x32xf32>
    %317 = arith.mulf %312, %316 : vector<8x32xf32>
    %c0_54 = arith.constant 0 : index
    %c0_55 = arith.constant 0 : index
    %318 = vector.load %arg2[%c0_54, %c0_55] : memref<33x8xf32, #tpu.memory_space<vmem>>, vector<33x8xf32>
    %319 = vector.extract_strided_slice %318 {offsets = [0, 0], sizes = [32, 8], strides = [1, 1]} : vector<33x8xf32> to vector<32x8xf32>
    %cst_56 = arith.constant dense<0.000000e+00> : vector<8x8xf32>
    %320 = tpu.matmul %317, %319, %cst_56 {dimension_numbers = #tpu.dot_dimension_numbers<[1], [0], [0], [1], [0, 0, 1, 1], [], []>} : vector<8x32xf32>, vector<32x8xf32>, vector<8x8xf32> -> vector<8x8xf32>
    %321 = vector.extract_strided_slice %318 {offsets = [32, 0], sizes = [1, 8], strides = [1, 1]} : vector<33x8xf32> to vector<1x8xf32>
    %322 = vector.broadcast %321 : vector<1x8xf32> to vector<8x8xf32>
    %323 = arith.addf %320, %322 : vector<8x8xf32>
    %324 = vector.extract_strided_slice %323 {offsets = [0, 0], sizes = [2, 8], strides = [1, 1]} : vector<8x8xf32> to vector<2x8xf32>
    %c0_57 = arith.constant 0 : index
    %c0_58 = arith.constant 0 : index
    %325 = vector.load %arg3[%c0_57, %c0_58] : memref<2x8xf32, #tpu.memory_space<vmem>>, vector<2x8xf32>
    tpu.vector_store %arg3[%c0_57, %c0_58], %324 {strides = array<i32>} : memref<2x8xf32, #tpu.memory_space<vmem>>, vector<2x8xf32>,
    return
  }
}

</mosaic_0001>

<bundles_post_ra>
// kernel: simple_lstm_forward.1
= control target key start
LH: loop header
LB: loop body
LE: loop exit
PB: predicated region body
PF: predicated region fallthrough
CT: control target
= control target key end

     0   :  { %vm36_vm0 = vcmask 261120   ;;  %v2700_v4 = vmov 0.0|0.0   ;;  %vm2701_vm1 = vmmov 0   ;;  %v2702_v13 = vmov 0.0   ;;  %s3101_s0 = inlined_call_operand.vmem [shape: f32[64,32], index: 0, kind: input, shape index: {}]   ;;  %s3102_s1 = inlined_call_operand.vmem [shape: f32[2,65,128], index: 1, kind: input, shape index: {}]   ;;  %s3103_s2 = inlined_call_operand.vmem [shape: f32[33,8], index: 2, kind: input, shape index: {}]   ;;  %s3104_s3 = inlined_call_operand.hbm [shape: f32[2,8], index: 3, kind: output, shape index: {}]  }
   0x1   :  { %v23_v0 = vld [vmem:[%s3102_s1] sm:$0xff]  ;;  %v24_v1 = vld [vmem:[%s3102_s1 + $0x8] sm:$0xff]  ;;  %2432 = vmatprep.subr.bf16.mxu1 %v2700_v4  ;;  %v25_v6 = vld [vmem:[%s3102_s1 + $0x10] sm:$0xff]  ;;  %2225 = vmatprep.mubr.msk.f32.mxu1 %vm2701_vm1, %v2702_v13 }
   0x2   :  { %v27_v2 = vld [vmem:[%s3102_s1 + $0x20] sm:$0xff]  ;;  %v2424_v3 = vpack.c.bf16 %v24_v1, %v23_v0  ;;  %v28_v5 = vld [vmem:[%s3102_s1 + $0x28] sm:$0xff]  ;;  %v26_v7 = vld [vmem:[%s3102_s1 + $0x18] sm:$0xff] }
   0x3   :  { %v2745_v8 = vpack.c.bf16 %v28_v5, %v27_v2  ;;  %v2428_v9 = vpack.c.bf16 %v26_v7, %v25_v6  ;;  %v15_v10 = vld [vmem:[%s3101_s0] sm:$0xff]  ;;  %v29_v11 = vld [vmem:[%s3102_s1 + $0x30] sm:$0xff]  ;;  %v30_v12 = vld [vmem:[%s3102_s1 + $0x38] sm:$0xff] }
   0x4   :  { %2425 = vmatprep.subr.bf16.mxu0 %v2424_v3  ;;  %2205 = vmatprep.mubr.msk.f32.mxu0 %vm36_vm0, %v15_v10 }
   0x5   :  { %8 = vsyncpa [#allocation4], 0  ;;  %2427 = vmatpush3.bf16.msra.mxu0 %v2424_v3  ;;  %2434 = vmatpush3.bf16.msra.mxu1 %v2745_v8  ;;  %v2760_v14 = vpack.c.bf16 %v30_v12, %v29_v11  ;;  %v16_v15 = vld [vmem:[%s3101_s0 + $0x8] sm:$0xff]  ;;  %v2784_v16 = vld [vmem:[%s3102_s1 + $0x40] ss:$0 sm:$0xff]  ;;  %s2703_s7 = smov 64  }
   0x6   :  { %2429 = vmatprep.subr.bf16.mxu0 %v2428_v9  ;;  %2435 = vmatprep.subr.bf16.mxu1 %v2700_v4  ;;  %s2704_s8 = smov 32   ;;  %v17_v51 = vld [vmem:[%s3101_s0 + $0x10] sm:$0xff]  ;;  %v18_v52 = vld [vmem:[%s3101_s0 + $0x18] sm:$0xff]  ;;  %v19_v53 = vld [vmem:[%s3101_s0 + $0x20] sm:$0xff]  ;;  %s2705_s21 = smov [#allocation3]   ;;  %vm2013_vm2 = vcmask 58368  }
   0x7   :  { %v20_v54 = vld [vmem:[%s3101_s0 + $0x28] sm:$0xff]  ;;  %v21_v55 = vld [vmem:[%s3101_s0 + $0x30] sm:$0xff]  ;;  %v22_v56 = vld [vmem:[%s3101_s0 + $0x38] sm:$0xff]  ;;  %s2021_s22 = sshll.u32 %s2705_s21, 4  ;;  %s2022_s22 = int_to_ptr.vmem [resolvable:$true] %s2021_s22 }
   0x8   :  { %p2681_p1 = scmp.lt.s32.totalorder %s2022_s22, %s2022_s22 }
   0x9   :  { %2431 = vmatpush3.bf16.msra.mxu0 %v2428_v9  ;;  %2437 = vmatpush3.bf16.msra.mxu1 %v2760_v14 }
   0xa   :  { %2438 = vmatprep.subr.bf16.mxu1 %v2700_v4  ;;  %2444 = vmatprep.subr.bf16.mxu0 %v2700_v4 }
   0xc   :  { %2206 = vmatmul.mubr.msk.f32.vlgmr.msra.gmra.mrb[0].mxu0 %vm36_vm0, %v16_v15  ;;  %2226 = vmatmul.mubr.f32.vlgmr.msra.gmra.mrb[0].mxu1 %v2702_v13 }
   0xd   :  { %2440 = vmatpush3.bf16.msra.mxu1 %v2745_v8  ;;  %2236 = vmatprep.mubr.msk.f32.mxu1 %vm2701_vm1, %v2702_v13 }
   0xe   :  { %2441 = vmatprep.subr.bf16.mxu1 %v2700_v4  ;;  %2446 = vmatpush3.bf16.msra.mxu0 %v2745_v8 }
   0xf   :  { %2447 = vmatprep.subr.bf16.mxu0 %v2700_v4  ;;  %2208 = vmatprep.mubr.msk.f32.mxu0 %vm36_vm0, %v17_v51 }
  0x10   :  { %2209 = vmatmul.mubr.msk.f32.gmra.mrb[2].mxu0 %vm36_vm0, %v18_v52 }
  0x11   :  { %2443 = vmatpush3.bf16.msra.mxu1 %v2760_v14  ;;  %2211 = vmatprep.mubr.msk.f32.mxu0 %vm36_vm0, %v19_v53 }
  0x12   :  { %2449 = vmatpush3.bf16.msra.mxu0 %v2760_v14  ;;  %2450 = vmatprep.subr.bf16.mxu1 %v2700_v4 }
  0x13   :  { %2456 = vmatprep.subr.bf16.mxu0 %v2700_v4 }
  0x14   :  { %2212 = vmatmul.mubr.msk.f32.gmra.mrb[4].mxu0 %vm36_vm0, %v20_v54 }
  0x15   :  { %2214 = vmatprep.mubr.msk.f32.mxu0 %vm36_vm0, %v21_v55 }
  0x18   :  { %2215 = vmatmul.mubr.msk.f32.gmra.mrb[6].mxu0 %vm36_vm0, %v22_v56 }
  0x19   :  { %2247 = vmatprep.mubr.msk.f32.mxu0 %vm2701_vm1, %v2702_v13 }
  0xdf   :  { %v2207_v17 = vpop.f32.mrb[0].mxu0  ;;  %v235_v18 = vpop.f32.mrb[0].mxu1 }
  0xe0   :  { %v127_v19 = vpop.f32.mrb[1].mxu0  ;;  %v2227_v20 = vpop.f32.mrb[1].mxu1  ;;  %v133_v37 = vadd.f32 %v2207_v17, %v2784_v16 }
  0xe1   :  { %v128_v21 = vadd.f32 %v2784_v16, %v127_v19 }
  0xe3   :  { %v239_v22 = vadd.f32 %v235_v18, %v128_v21  ;;  %v2210_v60 = vpop.f32.mrb[2].mxu0 }
  0xe4   :  { %v137_v61 = vpop.f32.mrb[3].mxu0 }
  0xe5   :  { %2548 = vtanh.f32 %v239_v22  ;;  %v2038_v24 = vmul.f32 -1.442695, %v239_v22  ;;  %v138_v3 = vadd.f32 %v2784_v16, %v137_v61 }
  0xe7   :  { %2550 = vpow2.f32 %v2038_v24  ;;  %v2830_v62 = vpop.f32.mrb[4].mxu0 }
  0xe8   :  { %v2832_v63 = vpop.f32.mrb[5].mxu0 }
  0xeb   :  { %v2834_v0 = vpop.f32.mrb[6].mxu0 }
  0xec   :  { %v2836_v1 = vpop.f32.mrb[7].mxu0 }
  0xef   :  { %v2549_v23 = vpop.eup %2548 }
  0xf0   :  { %249 = vrot.lane.b32.xlu0 %v2549_v23, %s2703_s7 }
  0xf1   :  { %v2551_v25 = vpop.eup %2550 }
  0xf2   :  { %v243_v26 = vadd.f32 1.0, %v2551_v25 }
  0xf4   :  { %2552 = vrcp.f32 %v243_v26  ;;  %v143_v26 = vadd.f32 %v2210_v60, %v2784_v16 }
  0xfe   :  { %v2553_v27 = vpop.eup %2552 }
  0xff   :  { %v247_v30 = vmul.f32 0.0, %v2553_v27 }
 0x162   :  { %v250_v28 = vpop.permute.xlu0 %249 }
 0x163   :  { %v252_v29 = vmul.f32 %v2553_v27, %v250_v28 }
 0x165   :  { %254 = vrot.lane.b32.xlu0 %v252_v29, %s2704_s8 }
 0x1d7   :  { %v255_v31 = vpop.permute.xlu0 %254 }
 0x1d8   :  { %v257_v32 = vadd.f32 %v255_v31, %v247_v30 }
 0x1da   :  { %2554 = vtanh.f32 %v257_v32 }
 0x1e4   :  { %v2555_v33 = vpop.eup %2554 }
 0x1e5   :  { %260 = vrot.lane.b32.xlu1 %v2555_v33, %s2703_s7 }
 0x257   :  { %v261_v34 = vpop.permute.xlu1 %260 }
 0x258   :  { %v263_v35 = vmul.f32 %v2553_v27, %v261_v34 }
 0x25a   :  { %265 = vrot.lane.b32.xlu1 %v263_v35, %s2704_s8 }
 0x2cc   :  { %v266_v36 = vpop.permute.xlu1 %265 }
 0x2cd   :  { %268 = vst.msk [vmem:[#allocation2] sm:$0xff] %vm36_vm0, %v266_v36  ;;  %2237 = vmatmul.mubr.msk.f32.vlgmr.msra.gmra.mrb[2].mxu1 %vm36_vm0, %v266_v36 }
 0x2ce   :  { %2452 = vmatpush3.bf16.msra.mxu1 %v2745_v8  ;;  %2258 = vmatprep.mubr.msk.f32.mxu1 %vm2701_vm1, %v2702_v13 }
 0x2cf   :  { %2453 = vmatprep.subr.bf16.mxu1 %v2700_v4 }
 0x2d2   :  { %2455 = vmatpush3.bf16.msra.mxu1 %v2760_v14 }
 0x2d3   :  { %2462 = vmatprep.subr.bf16.mxu1 %v2700_v4 }
 0x3a0   :  { %v337_v38 = vpop.f32.mrb[2].mxu1 }
 0x3a1   :  { %v341_v39 = vadd.f32 %v337_v38, %v133_v37  ;;  %v2238_v40 = vpop.f32.mrb[3].mxu1 }
 0x3a3   :  { %2556 = vtanh.f32 %v341_v39  ;;  %v2040_v42 = vmul.f32 -1.442695, %v341_v39 }
 0x3a5   :  { %2558 = vpow2.f32 %v2040_v42 }
 0x3ad   :  { %v2557_v41 = vpop.eup %2556 }
 0x3ae   :  { %351 = vrot.lane.b32.xlu0 %v2557_v41, %s2703_s7 }
 0x3af   :  { %v2559_v43 = vpop.eup %2558 }
 0x3b0   :  { %v345_v44 = vadd.f32 1.0, %v2559_v43 }
 0x3b2   :  { %2560 = vrcp.f32 %v345_v44  ;;  %v148_v44 = vadd.f32 %v2784_v16, %v2832_v63  ;;  %v153_v63 = vadd.f32 %v2830_v62, %v2784_v16 }
 0x3bc   :  { %v2561_v45 = vpop.eup %2560 }
 0x3bd   :  { %v349_v48 = vmul.f32 %v2561_v45, %v257_v32 }
 0x420   :  { %v352_v46 = vpop.permute.xlu0 %351 }
 0x421   :  { %v354_v47 = vmul.f32 %v2561_v45, %v352_v46 }
 0x423   :  { %356 = vrot.lane.b32.xlu1 %v354_v47, %s2704_s8 }
 0x495   :  { %v357_v49 = vpop.permute.xlu1 %356 }
 0x496   :  { %v359_v50 = vadd.f32 %v357_v49, %v349_v48 }
 0x498   :  { %2562 = vtanh.f32 %v359_v50 }
 0x4a2   :  { %v2563_v57 = vpop.eup %2562 }
 0x4a3   :  { %362 = vrot.lane.b32.xlu0 %v2563_v57, %s2703_s7 }
 0x515   :  { %v363_v58 = vpop.permute.xlu0 %362 }
 0x516   :  { %v365_v59 = vmul.f32 %v2561_v45, %v363_v58 }
 0x518   :  { %367 = vrot.lane.b32.xlu1 %v365_v59, %s2704_s8 }
 0x58a   :  { %v368_v2 = vpop.permute.xlu1 %367 }
 0x58b   :  { %370 = vst.msk [vmem:[#allocation2 + $0x8] sm:$0xff] %vm36_vm0, %v368_v2  ;;  %2248 = vmatmul.mubr.msk.f32.vlgmr.msra.gmra.mrb[8].mxu0 %vm36_vm0, %v368_v2 }
 0x58c   :  { %2458 = vmatpush3.bf16.msra.mxu0 %v2745_v8  ;;  %2269 = vmatprep.mubr.msk.f32.mxu0 %vm2701_vm1, %v2702_v13 }
 0x58d   :  { %2459 = vmatprep.subr.bf16.mxu0 %v2700_v4 }
 0x590   :  { %2461 = vmatpush3.bf16.msra.mxu0 %v2760_v14 }
 0x591   :  { %2468 = vmatprep.subr.bf16.mxu0 %v2700_v4 }
 0x65e   :  { %v439_v5 = vpop.f32.mrb[8].mxu0 }
 0x65f   :  { %v443_v6 = vadd.f32 %v439_v5, %v138_v3  ;;  %v2249_v7 = vpop.f32.mrb[9].mxu0 }
 0x661   :  { %2564 = vtanh.f32 %v443_v6  ;;  %v2042_v10 = vmul.f32 -1.442695, %v443_v6 }
 0x663   :  { %2566 = vpow2.f32 %v2042_v10 }
 0x66b   :  { %v2565_v9 = vpop.eup %2564 }
 0x66c   :  { %453 = vrot.lane.b32.xlu0 %v2565_v9, %s2703_s7 }
 0x66d   :  { %v2567_v11 = vpop.eup %2566 }
 0x66e   :  { %v447_v12 = vadd.f32 1.0, %v2567_v11 }
 0x670   :  { %2568 = vrcp.f32 %v447_v12 }
 0x67a   :  { %v2569_v15 = vpop.eup %2568 }
 0x67b   :  { %v451_v19 = vmul.f32 %v2569_v15, %v359_v50 }
 0x6de   :  { %v454_v17 = vpop.permute.xlu0 %453 }
 0x6df   :  { %v456_v18 = vmul.f32 %v2569_v15, %v454_v17  ;;  %v2053_v17 = vld [vmem:[%s3102_s1 + $0x48] sm:$0xff] }
 0x6e1   :  { %458 = vrot.lane.b32.xlu1 %v456_v18, %s2704_s8  ;;  %v2054_v18 = vld [vmem:[%s3102_s1 + $0x50] sm:$0xff] }
 0x753   :  { %v459_v20 = vpop.permute.xlu1 %458 }
 0x754   :  { %v461_v21 = vadd.f32 %v459_v20, %v451_v19  ;;  %v2480_v19 = vpack.c.bf16 %v2054_v18, %v2053_v17 }
 0x756   :  { %2570 = vtanh.f32 %v461_v21 }
 0x760   :  { %v2571_v22 = vpop.eup %2570 }
 0x761   :  { %464 = vrot.lane.b32.xlu0 %v2571_v22, %s2703_s7 }
 0x7d3   :  { %v465_v23 = vpop.permute.xlu0 %464 }
 0x7d4   :  { %v467_v24 = vmul.f32 %v2569_v15, %v465_v23  ;;  %v2055_v23 = vld [vmem:[%s3102_s1 + $0x58] sm:$0xff] }
 0x7d6   :  { %469 = vrot.lane.b32.xlu1 %v467_v24, %s2704_s8  ;;  %v2056_v24 = vld [vmem:[%s3102_s1 + $0x60] sm:$0xff] }
 0x848   :  { %v470_v25 = vpop.permute.xlu1 %469 }
 0x849   :  { %472 = vst.msk [vmem:[#allocation2 + $0x10] sm:$0xff] %vm36_vm0, %v470_v25  ;;  %2259 = vmatmul.mubr.msk.f32.vlgmr.msra.gmra.mrb[4].mxu1 %vm36_vm0, %v470_v25  ;;  %v2484_v25 = vpack.c.bf16 %v2056_v24, %v2055_v23 }
 0x84a   :  { %2464 = vmatpush3.bf16.msra.mxu1 %v2745_v8  ;;  %2280 = vmatprep.mubr.msk.f32.mxu1 %vm2701_vm1, %v2702_v13 }
 0x84b   :  { %2465 = vmatprep.subr.bf16.mxu1 %v2700_v4 }
 0x84e   :  { %2467 = vmatpush3.bf16.msra.mxu1 %v2760_v14 }
 0x84f   :  { %2474 = vmatprep.subr.bf16.mxu1 %v2700_v4 }
 0x91c   :  { %v541_v27 = vpop.f32.mrb[4].mxu1 }
 0x91d   :  { %v545_v28 = vadd.f32 %v541_v27, %v143_v26  ;;  %v2260_v29 = vpop.f32.mrb[5].mxu1  ;;  %v983_v27 = vld [vmem:[#allocation2] sm:$0xff] }
 0x91e   :  { %v985_v29 = vld [vmem:[#allocation2 + $0x10] sm:$0xff] }
 0x91f   :  { %2572 = vtanh.f32 %v545_v28  ;;  %v2044_v31 = vmul.f32 -1.442695, %v545_v28  ;;  %v984_v28 = vld [vmem:[#allocation2 + $0x8] sm:$0xff] }
 0x921   :  { %2574 = vpow2.f32 %v2044_v31 }
 0x929   :  { %v2573_v30 = vpop.eup %2572 }
 0x92a   :  { %555 = vrot.lane.b32.xlu0 %v2573_v30, %s2703_s7 }
 0x92b   :  { %v2575_v32 = vpop.eup %2574 }
 0x92c   :  { %v549_v33 = vadd.f32 1.0, %v2575_v32 }
 0x92e   :  { %2576 = vrcp.f32 %v549_v33  ;;  %v158_v33 = vadd.f32 %v2784_v16, %v2836_v1 }
 0x938   :  { %v2577_v34 = vpop.eup %2576 }
 0x939   :  { %v553_v37 = vmul.f32 %v2577_v34, %v461_v21 }
 0x99c   :  { %v556_v35 = vpop.permute.xlu0 %555 }
 0x99d   :  { %v558_v36 = vmul.f32 %v2577_v34, %v556_v35 }
 0x99f   :  { %560 = vrot.lane.b32.xlu1 %v558_v36, %s2704_s8 }
 0xa11   :  { %v561_v38 = vpop.permute.xlu1 %560 }
 0xa12   :  { %v563_v39 = vadd.f32 %v561_v38, %v553_v37 }
 0xa14   :  { %2578 = vtanh.f32 %v563_v39 }
 0xa1e   :  { %v2579_v40 = vpop.eup %2578 }
 0xa1f   :  { %566 = vrot.lane.b32.xlu0 %v2579_v40, %s2703_s7 }
 0xa91   :  { %v567_v41 = vpop.permute.xlu0 %566 }
 0xa92   :  { %v569_v42 = vmul.f32 %v2577_v34, %v567_v41 }
 0xa94   :  { %571 = vrot.lane.b32.xlu1 %v569_v42, %s2704_s8 }
 0xb06   :  { %v572_v43 = vpop.permute.xlu1 %571 }
 0xb07   :  { %574 = vst.msk [vmem:[#allocation2 + $0x18] sm:$0xff] %vm36_vm0, %v572_v43  ;;  %2270 = vmatmul.mubr.msk.f32.vlgmr.msra.gmra.mrb[10].mxu0 %vm36_vm0, %v572_v43 }
 0xb08   :  { %2470 = vmatpush3.bf16.msra.mxu0 %v2745_v8  ;;  %2291 = vmatprep.mubr.msk.f32.mxu0 %vm2701_vm1, %v2702_v13 }
 0xb09   :  { %2471 = vmatprep.subr.bf16.mxu0 %v2700_v4 }
 0xb0c   :  { %2473 = vmatpush3.bf16.msra.mxu0 %v2760_v14 }
 0xb0d   :  { %2481 = vmatprep.subr.bf16.mxu0 %v2480_v19 }
 0xb0e   :  { %v986_v30 = vld [vmem:[#allocation2 + $0x18] sm:$0xff] }
 0xbda   :  { %v643_v45 = vpop.f32.mrb[10].mxu0 }
 0xbdb   :  { %v647_v46 = vadd.f32 %v643_v45, %v148_v44  ;;  %v2271_v47 = vpop.f32.mrb[11].mxu0 }
 0xbdd   :  { %2580 = vtanh.f32 %v647_v46  ;;  %v2046_v49 = vmul.f32 -1.442695, %v647_v46 }
 0xbdf   :  { %2582 = vpow2.f32 %v2046_v49 }
 0xbe7   :  { %v2581_v48 = vpop.eup %2580 }
 0xbe8   :  { %657 = vrot.lane.b32.xlu0 %v2581_v48, %s2703_s7 }
 0xbe9   :  { %v2583_v50 = vpop.eup %2582 }
 0xbea   :  { %v651_v51 = vadd.f32 1.0, %v2583_v50 }
 0xbec   :  { %2584 = vrcp.f32 %v651_v51 }
 0xbf6   :  { %v2585_v52 = vpop.eup %2584 }
 0xbf7   :  { %v655_v55 = vmul.f32 %v2585_v52, %v563_v39 }
 0xc5a   :  { %v658_v53 = vpop.permute.xlu0 %657 }
 0xc5b   :  { %v660_v54 = vmul.f32 %v2585_v52, %v658_v53  ;;  %v2057_v53 = vld [vmem:[%s3102_s1 + $0x68] sm:$0xff] }
 0xc5d   :  { %662 = vrot.lane.b32.xlu1 %v660_v54, %s2704_s8  ;;  %v2058_v54 = vld [vmem:[%s3102_s1 + $0x70] sm:$0xff] }
 0xccf   :  { %v663_v56 = vpop.permute.xlu1 %662 }
 0xcd0   :  { %v665_v57 = vadd.f32 %v663_v56, %v655_v55  ;;  %v2936_v55 = vpack.c.bf16 %v2058_v54, %v2057_v53  ;;  %v2059_v56 = vld [vmem:[%s3102_s1 + $0x78] sm:$0xff] }
 0xcd2   :  { %2586 = vtanh.f32 %v665_v57 }
 0xcdc   :  { %v2587_v58 = vpop.eup %2586 }
 0xcdd   :  { %668 = vrot.lane.b32.xlu0 %v2587_v58, %s2703_s7 }
 0xd4f   :  { %v669_v59 = vpop.permute.xlu0 %668 }
 0xd50   :  { %v671_v60 = vmul.f32 %v2585_v52, %v669_v59 }
 0xd52   :  { %673 = vrot.lane.b32.xlu1 %v671_v60, %s2704_s8 }
 0xdc4   :  { %v674_v61 = vpop.permute.xlu1 %673 }
 0xdc5   :  { %676 = vst.msk [vmem:[#allocation2 + $0x20] sm:$0xff] %vm36_vm0, %v674_v61  ;;  %2281 = vmatmul.mubr.msk.f32.vlgmr.msra.gmra.mrb[6].mxu1 %vm36_vm0, %v674_v61 }
 0xdc6   :  { %2476 = vmatpush3.bf16.msra.mxu1 %v2745_v8  ;;  %2302 = vmatprep.mubr.msk.f32.mxu1 %vm2701_vm1, %v2702_v13 }
 0xdc7   :  { %2477 = vmatprep.subr.bf16.mxu1 %v2700_v4 }
 0xdca   :  { %2479 = vmatpush3.bf16.msra.mxu1 %v2760_v14 }
 0xdcb   :  { %2488 = vmatprep.subr.bf16.mxu1 %v2700_v4 }
 0xdcc   :  { %v987_v31 = vld [vmem:[#allocation2 + $0x20] sm:$0xff] }
 0xe98   :  { %v745_v2 = vpop.f32.mrb[6].mxu1 }
 0xe99   :  { %v749_v3 = vadd.f32 %v745_v2, %v153_v63  ;;  %v2282_v5 = vpop.f32.mrb[7].mxu1  ;;  %v163_v2 = vadd.f32 %v2834_v0, %v2784_v16 }
 0xe9b   :  { %2588 = vtanh.f32 %v749_v3  ;;  %v2048_v8 = vmul.f32 -1.442695, %v749_v3 }
 0xe9d   :  { %2590 = vpow2.f32 %v2048_v8  ;;  %v2972_v8 = vld [vmem:[%s3102_s1 + $0x88] ss:$0 sm:$0xff] }
 0xea5   :  { %v2589_v6 = vpop.eup %2588 }
 0xea6   :  { %759 = vrot.lane.b32.xlu0 %v2589_v6, %s2703_s7 }
 0xea7   :  { %v2591_v7 = vpop.eup %2590 }
 0xea8   :  { %v753_v9 = vadd.f32 1.0, %v2591_v7 }
 0xeaa   :  { %2592 = vrcp.f32 %v753_v9 }
 0xeb4   :  { %v2593_v10 = vpop.eup %2592 }
 0xeb5   :  { %v757_v12 = vmul.f32 %v2593_v10, %v665_v57  ;;  %v2060_v57 = vld [vmem:[%s3102_s1 + $0x80] sm:$0xff] }
 0xeb6   :  { %v2946_v58 = vpack.c.bf16 %v2060_v57, %v2059_v56 }
 0xf18   :  { %v760_v11 = vpop.permute.xlu0 %759 }
 0xf19   :  { %v762_v14 = vmul.f32 %v2593_v10, %v760_v11 }
 0xf1b   :  { %764 = vrot.lane.b32.xlu1 %v762_v14, %s2704_s8 }
 0xf8d   :  { %v765_v15 = vpop.permute.xlu1 %764 }
 0xf8e   :  { %v767_v62 = vadd.f32 %v765_v15, %v757_v12 }
 0xf90   :  { %2594 = vtanh.f32 %v767_v62 }
 0xf9a   :  { %v2595_v20 = vpop.eup %2594 }
 0xf9b   :  { %770 = vrot.lane.b32.xlu0 %v2595_v20, %s2703_s7 }
0x100d   :  { %v771_v21 = vpop.permute.xlu0 %770 }
0x100e   :  { %v773_v22 = vmul.f32 %v2593_v10, %v771_v21 }
0x1010   :  { %775 = vrot.lane.b32.xlu1 %v773_v22, %s2704_s8 }
0x1082   :  { %v776_v26 = vpop.permute.xlu1 %775 }
0x1083   :  { %778 = vst.msk [vmem:[#allocation2 + $0x28] sm:$0xff] %vm36_vm0, %v776_v26  ;;  %2292 = vmatmul.mubr.msk.f32.vlgmr.msra.gmra.mrb[12].mxu0 %vm36_vm0, %v776_v26 }
0x1084   :  { %2483 = vmatpush3.bf16.msra.mxu0 %v2480_v19  ;;  %2313 = vmatprep.mubr.msk.f32.mxu0 %vm36_vm0, %v983_v27 }
0x1085   :  { %2485 = vmatprep.subr.bf16.mxu0 %v2484_v25 }
0x1088   :  { %2487 = vmatpush3.bf16.msra.mxu0 %v2484_v25 }
0x1089   :  { %2500 = vmatprep.subr.bf16.mxu0 %v2700_v4 }
0x108a   :  { %v988_v32 = vld [vmem:[#allocation2 + $0x28] sm:$0xff] }
0x108b   :  { %2314 = vmatmul.mubr.msk.f32.vlgmr.msra.gmra.mrb[14].mxu0 %vm36_vm0, %v984_v28 }
0x108c   :  { %2316 = vmatprep.mubr.msk.f32.mxu0 %vm36_vm0, %v985_v29  ;;  %2502 = vmatpush3.bf16.msra.mxu0 %v2936_v55 }
0x108d   :  { %2503 = vmatprep.subr.bf16.mxu0 %v2700_v4 }
0x108f   :  { %2317 = vmatmul.mubr.msk.f32.gmra.mrb[16].mxu0 %vm36_vm0, %v986_v30 }
0x1090   :  { %2319 = vmatprep.mubr.msk.f32.mxu0 %vm36_vm0, %v987_v31  ;;  %2505 = vmatpush3.bf16.msra.mxu0 %v2946_v58 }
0x1091   :  { %2512 = vmatprep.subr.bf16.mxu0 %v2700_v4 }
0x1093   :  { %2320 = vmatmul.mubr.msk.f32.gmra.mrb[18].mxu0 %vm36_vm0, %v988_v32 }
0x1156   :  { %v847_v34 = vpop.f32.mrb[12].mxu0 }
0x1157   :  { %v851_v35 = vadd.f32 %v847_v34, %v158_v33  ;;  %v2293_v36 = vpop.f32.mrb[13].mxu0 }
0x1159   :  { %2596 = vtanh.f32 %v851_v35  ;;  %v2050_v44 = vmul.f32 -1.442695, %v851_v35 }
0x115b   :  { %2598 = vpow2.f32 %v2050_v44 }
0x115e   :  { %v2914_v37 = vpop.f32.mrb[14].mxu0 }
0x115f   :  { %v1095_v38 = vpop.f32.mrb[15].mxu0 }
0x1160   :  { %v1096_v7 = vadd.f32 %v2972_v8, %v1095_v38 }
0x1162   :  { %v2916_v39 = vpop.f32.mrb[16].mxu0 }
0x1163   :  { %v2597_v40 = vpop.eup %2596  ;;  %v2918_v41 = vpop.f32.mrb[17].mxu0 }
0x1164   :  { %861 = vrot.lane.b32.xlu0 %v2597_v40, %s2703_s7  ;;  %v1101_v40 = vadd.f32 %v2914_v37, %v2972_v8 }
0x1165   :  { %v2599_v1 = vpop.eup %2598 }
0x1166   :  { %v2921_v42 = vpop.f32.mrb[18].mxu0  ;;  %v855_v45 = vadd.f32 1.0, %v2599_v1 }
0x1167   :  { %v2923_v43 = vpop.f32.mrb[19].mxu0 }
0x1168   :  { %2600 = vrcp.f32 %v855_v45 }
0x1172   :  { %v2601_v46 = vpop.eup %2600 }
0x1173   :  { %v859_v49 = vmul.f32 %v2601_v46, %v767_v62 }
0x11d6   :  { %v862_v47 = vpop.permute.xlu0 %861 }
0x11d7   :  { %v864_v48 = vmul.f32 %v2601_v46, %v862_v47 }
0x11d9   :  { %866 = vrot.lane.b32.xlu1 %v864_v48, %s2704_s8 }
0x124b   :  { %v867_v50 = vpop.permute.xlu1 %866 }
0x124c   :  { %v2926_v51 = vadd.f32 %v867_v50, %v859_v49 }
0x124e   :  { %2602 = vtanh.f32 %v2926_v51 }
0x1258   :  { %v2603_v52 = vpop.eup %2602 }
0x1259   :  { %872 = vrot.lane.b32.xlu0 %v2603_v52, %s2703_s7 }
0x12cb   :  { %v873_v59 = vpop.permute.xlu0 %872 }
0x12cc   :  { %v875_v60 = vmul.f32 %v2601_v46, %v873_v59 }
0x12ce   :  { %877 = vrot.lane.b32.xlu1 %v875_v60, %s2704_s8 }
0x1340   :  { %v878_v61 = vpop.permute.xlu1 %877 }
0x1341   :  { %880 = vst.msk [vmem:[#allocation2 + $0x30] sm:$0xff] %vm36_vm0, %v878_v61  ;;  %2303 = vmatmul.mubr.msk.f32.vlgmr.msra.gmra.mrb[8].mxu1 %vm36_vm0, %v878_v61 }
0x1342   :  { %2490 = vmatpush3.bf16.msra.mxu1 %v2936_v55  ;;  %2333 = vmatprep.mubr.msk.f32.mxu1 %vm2701_vm1, %v2702_v13 }
0x1343   :  { %2491 = vmatprep.subr.bf16.mxu1 %v2700_v4 }
0x1346   :  { %2493 = vmatpush3.bf16.msra.mxu1 %v2946_v58 }
0x1347   :  { %2494 = vmatprep.subr.bf16.mxu1 %v2700_v4 }
0x1348   :  { %v989_v63 = vld [vmem:[#allocation2 + $0x30] sm:$0xff] }
0x1349   :  { %2334 = vmatmul.mubr.f32.vlgmr.msra.gmra.mrb[10].mxu1 %v2702_v13  ;;  %2322 = vmatprep.mubr.msk.f32.mxu0 %vm36_vm0, %v989_v63 }
0x134a   :  { %2496 = vmatpush3.bf16.msra.mxu1 %v2936_v55  ;;  %2344 = vmatprep.mubr.msk.f32.mxu1 %vm2701_vm1, %v2702_v13 }
0x134b   :  { %2497 = vmatprep.subr.bf16.mxu1 %v2700_v4 }
0x134e   :  { %2499 = vmatpush3.bf16.msra.mxu1 %v2946_v58 }
0x134f   :  { %2506 = vmatprep.subr.bf16.mxu1 %v2700_v4 }
0x1414   :  { %v949_v3 = vpop.f32.mrb[8].mxu1 }
0x1415   :  { %v953_v5 = vadd.f32 %v949_v3, %v163_v2  ;;  %v2304_v6 = vpop.f32.mrb[9].mxu1 }
0x1417   :  { %v2052_v23 = vmul.f32 -1.442695, %v953_v5 }
0x141c   :  { %v1200_v9 = vpop.f32.mrb[10].mxu1 }
0x141d   :  { %v1204_v10 = vadd.f32 %v1200_v9, %v1096_v7  ;;  %v2335_v11 = vpop.f32.mrb[11].mxu1 }
0x141f   :  { %2604 = vtanh.f32 %v1204_v10  ;;  %v2071_v12 = vmul.f32 -1.442695, %v1204_v10 }
0x1421   :  { %2606 = vpow2.f32 %v2071_v12 }
0x1429   :  { %v2605_v14 = vpop.eup %2604 }
0x142a   :  { %1214 = vrot.lane.b32.xlu0 %v2605_v14, %s2703_s7 }
0x142b   :  { %v2607_v16 = vpop.eup %2606 }
0x142c   :  { %v1208_v0 = vadd.f32 1.0, %v2607_v16 }
0x142e   :  { %2608 = vrcp.f32 %v1208_v0 }
0x1438   :  { %v2609_v15 = vpop.eup %2608 }
0x1439   :  { %v1212_v18 = vmul.f32 0.0, %v2609_v15 }
0x149c   :  { %v1215_v62 = vpop.permute.xlu0 %1214 }
0x149d   :  { %v1217_v17 = vmul.f32 %v2609_v15, %v1215_v62 }
0x149f   :  { %1219 = vrot.lane.b32.xlu1 %v1217_v17, %s2704_s8 }
0x1511   :  { %v1220_v19 = vpop.permute.xlu1 %1219 }
0x1512   :  { %v1222_v20 = vadd.f32 %v1220_v19, %v1212_v18 }
0x1514   :  { %2610 = vtanh.f32 %v1222_v20 }
0x1515   :  { %2612 = vtanh.f32 %v953_v5  ;;  %v1106_v5 = vadd.f32 %v2972_v8, %v2918_v41 }
0x1516   :  { %2614 = vpow2.f32 %v2052_v23 }
0x151e   :  { %v2611_v21 = vpop.eup %2610 }
0x151f   :  { %1225 = vrot.lane.b32.xlu0 %v2611_v21, %s2703_s7  ;;  %v2613_v22 = vpop.eup %2612 }
0x1520   :  { %v2615_v24 = vpop.eup %2614 }
0x1521   :  { %v957_v25 = vadd.f32 1.0, %v2615_v24 }
0x1523   :  { %963 = vrot.lane.b32.xlu0 %v2613_v22, %s2703_s7  ;;  %2616 = vrcp.f32 %v957_v25  ;;  %v1111_v22 = vadd.f32 %v2916_v39, %v2972_v8 }
0x152d   :  { %v2617_v28 = vpop.eup %2616 }
0x152e   :  { %v961_v32 = vmul.f32 %v2617_v28, %v2926_v51 }
0x1591   :  { %v1226_v26 = vpop.permute.xlu0 %1225 }
0x1592   :  { %v1228_v27 = vmul.f32 %v2609_v15, %v1226_v26 }
0x1594   :  { %1230 = vrot.lane.b32.xlu1 %v1228_v27, %s2704_s8 }
0x1595   :  { %v964_v29 = vpop.permute.xlu0 %963 }
0x1596   :  { %v966_v30 = vmul.f32 %v2617_v28, %v964_v29 }
0x1598   :  { %968 = vrot.lane.b32.xlu0 %v966_v30, %s2704_s8 }
0x1606   :  { %v1231_v31 = vpop.permute.xlu1 %1230 }
0x1607   :  { %2345 = vmatmul.mubr.msk.f32.vlgmr.msra.gmra.mrb[12].mxu1 %vm36_vm0, %v1231_v31 }
0x1608   :  { %2508 = vmatpush3.bf16.msra.mxu1 %v2936_v55  ;;  %2366 = vmatprep.mubr.msk.f32.mxu1 %vm2701_vm1, %v2702_v13 }
0x1609   :  { %2509 = vmatprep.subr.bf16.mxu1 %v2700_v4 }
0x160a   :  { %v969_v33 = vpop.permute.xlu0 %968 }
0x160b   :  { %v971_v34 = vadd.f32 %v969_v33, %v961_v32 }
0x160c   :  { %2511 = vmatpush3.bf16.msra.mxu1 %v2946_v58 }
0x160d   :  { %2618 = vtanh.f32 %v971_v34  ;;  %2518 = vmatprep.subr.bf16.mxu1 %v2700_v4 }
0x1617   :  { %v2619_v35 = vpop.eup %2618 }
0x1618   :  { %974 = vrot.lane.b32.xlu0 %v2619_v35, %s2703_s7 }
0x168a   :  { %v975_v36 = vpop.permute.xlu0 %974 }
0x168b   :  { %v977_v38 = vmul.f32 %v2617_v28, %v975_v36 }
0x168d   :  { %979 = vrot.lane.b32.xlu0 %v977_v38, %s2704_s8 }
0x16da   :  { %v1300_v44 = vpop.f32.mrb[12].mxu1 }
0x16db   :  { %v1304_v1 = vadd.f32 %v1300_v44, %v1101_v40  ;;  %v2346_v45 = vpop.f32.mrb[13].mxu1  ;;  %v1116_v44 = vadd.f32 %v2972_v8, %v2923_v43 }
0x16dd   :  { %2620 = vtanh.f32 %v1304_v1  ;;  %v2073_v49 = vmul.f32 -1.442695, %v1304_v1 }
0x16df   :  { %2622 = vpow2.f32 %v2073_v49 }
0x16e7   :  { %v2621_v46 = vpop.eup %2620 }
0x16e8   :  { %1314 = vrot.lane.b32.xlu1 %v2621_v46, %s2703_s7 }
0x16e9   :  { %v2623_v50 = vpop.eup %2622 }
0x16ea   :  { %v1308_v37 = vadd.f32 1.0, %v2623_v50 }
0x16ec   :  { %2624 = vrcp.f32 %v1308_v37 }
0x16f6   :  { %v2625_v51 = vpop.eup %2624 }
0x16f7   :  { %v1312_v54 = vmul.f32 %v2625_v51, %v1222_v20 }
0x16ff   :  { %v980_v47 = vpop.permute.xlu0 %979 }
0x1700   :  { %982 = vst.msk [vmem:[#allocation2 + $0x38] sm:$0xff] %vm36_vm0, %v980_v47 }
0x1707   :  { %v990_v48 = vld [vmem:[#allocation2 + $0x38] sm:$0xff] }
0x1708   :  { %2323 = vmatmul.mubr.msk.f32.gmra.mrb[20].mxu0 %vm36_vm0, %v990_v48 }
0x1709   :  { %2355 = vmatprep.mubr.msk.f32.mxu0 %vm2701_vm1, %v2702_v13 }
0x175a   :  { %v1315_v52 = vpop.permute.xlu1 %1314 }
0x175b   :  { %v1317_v53 = vmul.f32 %v2625_v51, %v1315_v52 }
0x175d   :  { %1319 = vrot.lane.b32.xlu1 %v1317_v53, %s2704_s8 }
0x17cf   :  { %v1320_v56 = vpop.permute.xlu1 %1319 }
0x17d0   :  { %v1322_v57 = vadd.f32 %v1320_v56, %v1312_v54 }
0x17d2   :  { %2626 = vtanh.f32 %v1322_v57 }
0x17db   :  { %v2999_v59 = vpop.f32.mrb[20].mxu0 }
0x17dc   :  { %v2627_v60 = vpop.eup %2626  ;;  %v3001_v61 = vpop.f32.mrb[21].mxu0 }
0x17dd   :  { %1325 = vrot.lane.b32.xlu1 %v2627_v60, %s2703_s7 }
0x184f   :  { %v1326_v63 = vpop.permute.xlu1 %1325 }
0x1850   :  { %v1328_v2 = vmul.f32 %v2625_v51, %v1326_v63 }
0x1852   :  { %1330 = vrot.lane.b32.xlu1 %v1328_v2, %s2704_s8  ;;  %v1121_v2 = vadd.f32 %v2921_v42, %v2972_v8 }
0x18c4   :  { %v1331_v3 = vpop.permute.xlu1 %1330 }
0x18c5   :  { %2356 = vmatmul.mubr.msk.f32.vlgmr.msra.gmra.mrb[22].mxu0 %vm36_vm0, %v1331_v3 }
0x18c6   :  { %2514 = vmatpush3.bf16.msra.mxu0 %v2936_v55  ;;  %2377 = vmatprep.mubr.msk.f32.mxu0 %vm2701_vm1, %v2702_v13 }
0x18c7   :  { %2515 = vmatprep.subr.bf16.mxu0 %v2700_v4 }
0x18ca   :  { %2517 = vmatpush3.bf16.msra.mxu0 %v2946_v58 }
0x18cb   :  { %2524 = vmatprep.subr.bf16.mxu0 %v2700_v4 }
0x1998   :  { %v1400_v6 = vpop.f32.mrb[22].mxu0 }
0x1999   :  { %v1404_v7 = vadd.f32 %v1400_v6, %v1106_v5  ;;  %v2357_v9 = vpop.f32.mrb[23].mxu0 }
0x199b   :  { %2628 = vtanh.f32 %v1404_v7  ;;  %v2075_v11 = vmul.f32 -1.442695, %v1404_v7 }
0x199d   :  { %2630 = vpow2.f32 %v2075_v11 }
0x19a5   :  { %v2629_v10 = vpop.eup %2628 }
0x19a6   :  { %1414 = vrot.lane.b32.xlu0 %v2629_v10, %s2703_s7 }
0x19a7   :  { %v2631_v14 = vpop.eup %2630 }
0x19a8   :  { %v1408_v12 = vadd.f32 1.0, %v2631_v14 }
0x19aa   :  { %2632 = vrcp.f32 %v1408_v12 }
0x19b4   :  { %v2633_v16 = vpop.eup %2632 }
0x19b5   :  { %v1412_v62 = vmul.f32 %v2633_v16, %v1322_v57 }
0x1a18   :  { %v1415_v0 = vpop.permute.xlu0 %1414 }
0x1a19   :  { %v1417_v15 = vmul.f32 %v2633_v16, %v1415_v0 }
0x1a1b   :  { %1419 = vrot.lane.b32.xlu1 %v1417_v15, %s2704_s8 }
0x1a8d   :  { %v1420_v17 = vpop.permute.xlu1 %1419 }
0x1a8e   :  { %v1422_v41 = vadd.f32 %v1420_v17, %v1412_v62 }
0x1a90   :  { %2634 = vtanh.f32 %v1422_v41 }
0x1a9a   :  { %v2635_v18 = vpop.eup %2634 }
0x1a9b   :  { %1425 = vrot.lane.b32.xlu0 %v2635_v18, %s2703_s7 }
0x1b0d   :  { %v1426_v19 = vpop.permute.xlu0 %1425 }
0x1b0e   :  { %v1428_v20 = vmul.f32 %v2633_v16, %v1426_v19 }
0x1b10   :  { %1430 = vrot.lane.b32.xlu1 %v1428_v20, %s2704_s8 }
0x1b82   :  { %v1431_v21 = vpop.permute.xlu1 %1430 }
0x1b83   :  { %2367 = vmatmul.mubr.msk.f32.vlgmr.msra.gmra.mrb[14].mxu1 %vm36_vm0, %v1431_v21 }
0x1b84   :  { %2520 = vmatpush3.bf16.msra.mxu1 %v2936_v55  ;;  %2388 = vmatprep.mubr.msk.f32.mxu1 %vm2701_vm1, %v2702_v13 }
0x1b85   :  { %2521 = vmatprep.subr.bf16.mxu1 %v2700_v4 }
0x1b88   :  { %2523 = vmatpush3.bf16.msra.mxu1 %v2946_v58 }
0x1b89   :  { %2530 = vmatprep.subr.bf16.mxu1 %v2700_v4 }
0x1c56   :  { %v1500_v23 = vpop.f32.mrb[14].mxu1 }
0x1c57   :  { %v1504_v24 = vadd.f32 %v1500_v23, %v1111_v22  ;;  %v2368_v25 = vpop.f32.mrb[15].mxu1 }
0x1c59   :  { %2636 = vtanh.f32 %v1504_v24  ;;  %v2077_v27 = vmul.f32 -1.442695, %v1504_v24 }
0x1c5b   :  { %2638 = vpow2.f32 %v2077_v27 }
0x1c63   :  { %v2637_v26 = vpop.eup %2636 }
0x1c64   :  { %1514 = vrot.lane.b32.xlu0 %v2637_v26, %s2703_s7 }
0x1c65   :  { %v2639_v28 = vpop.eup %2638 }
0x1c66   :  { %v1508_v29 = vadd.f32 1.0, %v2639_v28 }
0x1c68   :  { %2640 = vrcp.f32 %v1508_v29 }
0x1c72   :  { %v2641_v30 = vpop.eup %2640 }
0x1c73   :  { %v1512_v33 = vmul.f32 %v2641_v30, %v1422_v41  ;;  %v1126_v41 = vadd.f32 %v2972_v8, %v3001_v61 }
0x1cd6   :  { %v1515_v31 = vpop.permute.xlu0 %1514 }
0x1cd7   :  { %v1517_v32 = vmul.f32 %v2641_v30, %v1515_v31 }
0x1cd9   :  { %1519 = vrot.lane.b32.xlu1 %v1517_v32, %s2704_s8 }
0x1d4b   :  { %v1520_v34 = vpop.permute.xlu1 %1519 }
0x1d4c   :  { %v1522_v39 = vadd.f32 %v1520_v34, %v1512_v33  ;;  %v1131_v33 = vadd.f32 %v2999_v59, %v2972_v8  ;;  %v1929_v59 = vld [vmem:[%s3103_s2] sm:$0xff] }
0x1d4e   :  { %2642 = vtanh.f32 %v1522_v39 }
0x1d58   :  { %v2643_v35 = vpop.eup %2642 }
0x1d59   :  { %1525 = vrot.lane.b32.xlu0 %v2643_v35, %s2703_s7 }
0x1dcb   :  { %v1526_v36 = vpop.permute.xlu0 %1525 }
0x1dcc   :  { %v1528_v38 = vmul.f32 %v2641_v30, %v1526_v36 }
0x1dce   :  { %1530 = vrot.lane.b32.xlu1 %v1528_v38, %s2704_s8 }
0x1e40   :  { %v1531_v40 = vpop.permute.xlu1 %1530 }
0x1e41   :  { %2378 = vmatmul.mubr.msk.f32.vlgmr.msra.gmra.mrb[24].mxu0 %vm36_vm0, %v1531_v40 }
0x1e42   :  { %2526 = vmatpush3.bf16.msra.mxu0 %v2936_v55  ;;  %2399 = vmatprep.mubr.msk.f32.mxu0 %vm2701_vm1, %v2702_v13 }
0x1e43   :  { %2527 = vmatprep.subr.bf16.mxu0 %v2700_v4 }
0x1e46   :  { %2529 = vmatpush3.bf16.msra.mxu0 %v2946_v58 }
0x1e47   :  { %2536 = vmatprep.subr.bf16.mxu0 %v2700_v4 }
0x1f14   :  { %v1600_v1 = vpop.f32.mrb[24].mxu0 }
0x1f15   :  { %v1604_v45 = vadd.f32 %v1600_v1, %v1116_v44  ;;  %v2379_v46 = vpop.f32.mrb[25].mxu0 }
0x1f17   :  { %2644 = vtanh.f32 %v1604_v45  ;;  %v2079_v48 = vmul.f32 -1.442695, %v1604_v45 }
0x1f19   :  { %2646 = vpow2.f32 %v2079_v48 }
0x1f21   :  { %v2645_v47 = vpop.eup %2644 }
0x1f22   :  { %1614 = vrot.lane.b32.xlu0 %v2645_v47, %s2703_s7 }
0x1f23   :  { %v2647_v49 = vpop.eup %2646 }
0x1f24   :  { %v1608_v50 = vadd.f32 1.0, %v2647_v49  ;;  %v1930_v49 = vld [vmem:[%s3103_s2 + $0x8] sm:$0xff] }
0x1f26   :  { %2648 = vrcp.f32 %v1608_v50  ;;  %v1931_v50 = vld [vmem:[%s3103_s2 + $0x10] sm:$0xff] }
0x1f30   :  { %v2649_v37 = vpop.eup %2648 }
0x1f31   :  { %v1612_v53 = vmul.f32 %v2649_v37, %v1522_v39 }
0x1f94   :  { %v1615_v51 = vpop.permute.xlu0 %1614 }
0x1f95   :  { %v1617_v52 = vmul.f32 %v2649_v37, %v1615_v51  ;;  %v1932_v51 = vld [vmem:[%s3103_s2 + $0x18] sm:$0xff] }
0x1f97   :  { %1619 = vrot.lane.b32.xlu1 %v1617_v52, %s2704_s8  ;;  %v2540_v52 = vpack.c.bf16 %v1932_v51, %v1931_v50 }
0x2009   :  { %v1620_v54 = vpop.permute.xlu1 %1619 }
0x200a   :  { %v1622_v43 = vadd.f32 %v1620_v54, %v1612_v53 }
0x200c   :  { %2650 = vtanh.f32 %v1622_v43 }
0x2016   :  { %v2651_v56 = vpop.eup %2650 }
0x2017   :  { %1625 = vrot.lane.b32.xlu0 %v2651_v56, %s2703_s7 }
0x2089   :  { %v1626_v57 = vpop.permute.xlu0 %1625 }
0x208a   :  { %v1628_v60 = vmul.f32 %v2649_v37, %v1626_v57  ;;  %v2537_v37 = vpack.c.bf16 %v1930_v49, %v1929_v59  ;;  %v2086_v57 = vld [vmem:[%s3103_s2 + $0x20] ss:$0 sm:$0xff] }
0x208c   :  { %1630 = vrot.lane.b32.xlu1 %v1628_v60, %s2704_s8 }
0x20fe   :  { %v1631_v63 = vpop.permute.xlu1 %1630 }
0x20ff   :  { %2389 = vmatmul.mubr.msk.f32.vlgmr.msra.gmra.mrb[16].mxu1 %vm36_vm0, %v1631_v63 }
0x2100   :  { %2532 = vmatpush3.bf16.msra.mxu1 %v2936_v55  ;;  %2410 = vmatprep.mubr.msk.f32.mxu1 %vm2701_vm1, %v2702_v13 }
0x2101   :  { %2533 = vmatprep.subr.bf16.mxu1 %v2700_v4 }
0x2104   :  { %2535 = vmatpush3.bf16.msra.mxu1 %v2946_v58 }
0x21d2   :  { %v1700_v3 = vpop.f32.mrb[16].mxu1 }
0x21d3   :  { %v1704_v5 = vadd.f32 %v1700_v3, %v1121_v2  ;;  %v2390_v6 = vpop.f32.mrb[17].mxu1 }
0x21d5   :  { %2652 = vtanh.f32 %v1704_v5  ;;  %v2081_v9 = vmul.f32 -1.442695, %v1704_v5 }
0x21d7   :  { %2654 = vpow2.f32 %v2081_v9 }
0x21df   :  { %v2653_v7 = vpop.eup %2652 }
0x21e0   :  { %1714 = vrot.lane.b32.xlu0 %v2653_v7, %s2703_s7 }
0x21e1   :  { %v2655_v55 = vpop.eup %2654 }
0x21e2   :  { %v1708_v10 = vadd.f32 1.0, %v2655_v55 }
0x21e4   :  { %2656 = vrcp.f32 %v1708_v10 }
0x21ee   :  { %v2657_v11 = vpop.eup %2656 }
0x21ef   :  { %v1712_v58 = vmul.f32 %v2657_v11, %v1622_v43 }
0x2252   :  { %v1715_v14 = vpop.permute.xlu0 %1714 }
0x2253   :  { %v1717_v12 = vmul.f32 %v2657_v11, %v1715_v14 }
0x2255   :  { %1719 = vrot.lane.b32.xlu1 %v1717_v12, %s2704_s8 }
0x22c7   :  { %v1720_v16 = vpop.permute.xlu1 %1719 }
0x22c8   :  { %v1722_v42 = vadd.f32 %v1720_v16, %v1712_v58 }
0x22ca   :  { %2658 = vtanh.f32 %v1722_v42 }
0x22d4   :  { %v2659_v0 = vpop.eup %2658 }
0x22d5   :  { %1725 = vrot.lane.b32.xlu0 %v2659_v0, %s2703_s7 }
0x2347   :  { %v1726_v15 = vpop.permute.xlu0 %1725 }
0x2348   :  { %v1728_v62 = vmul.f32 %v2657_v11, %v1726_v15 }
0x234a   :  { %1730 = vrot.lane.b32.xlu1 %v1728_v62, %s2704_s8 }
0x23bc   :  { %v1731_v17 = vpop.permute.xlu1 %1730 }
0x23bd   :  { %2400 = vmatmul.mubr.msk.f32.vlgmr.msra.gmra.mrb[26].mxu0 %vm36_vm0, %v1731_v17 }
0x23be   :  { %2421 = vmatprep.mubr.msk.f32.mxu0 %vm2701_vm1, %v2702_v13  ;;  %2538 = vmatpush3.bf16.msra.mxu0 %v2537_v37 }
0x23bf   :  { %2539 = vmatprep.subr.bf16.mxu0 %v2700_v4 }
0x23c2   :  { %2541 = vmatpush3.bf16.msra.mxu0 %v2540_v52 }
0x2490   :  { %v1800_v18 = vpop.f32.mrb[26].mxu0 }
0x2491   :  { %v1804_v19 = vadd.f32 %v1800_v18, %v1126_v41  ;;  %v2401_v20 = vpop.f32.mrb[27].mxu0 }
0x2493   :  { %2660 = vtanh.f32 %v1804_v19  ;;  %v2083_v22 = vmul.f32 -1.442695, %v1804_v19 }
0x2495   :  { %2662 = vpow2.f32 %v2083_v22 }
0x249d   :  { %v2661_v21 = vpop.eup %2660 }
0x249e   :  { %1814 = vrot.lane.b32.xlu0 %v2661_v21, %s2703_s7 }
0x249f   :  { %v2663_v23 = vpop.eup %2662 }
0x24a0   :  { %v1808_v24 = vadd.f32 1.0, %v2663_v23 }
0x24a2   :  { %2664 = vrcp.f32 %v1808_v24 }
0x24ac   :  { %v2665_v25 = vpop.eup %2664 }
0x24ad   :  { %v1812_v13 = vmul.f32 %v2665_v25, %v1722_v42 }
0x2510   :  { %v1815_v26 = vpop.permute.xlu0 %1814 }
0x2511   :  { %v1817_v27 = vmul.f32 %v2665_v25, %v1815_v26 }
0x2513   :  { %1819 = vrot.lane.b32.xlu1 %v1817_v27, %s2704_s8 }
0x2585   :  { %v1820_v28 = vpop.permute.xlu1 %1819 }
0x2586   :  { %v1822_v61 = vadd.f32 %v1820_v28, %v1812_v13 }
0x2588   :  { %2666 = vtanh.f32 %v1822_v61 }
0x2592   :  { %v2667_v29 = vpop.eup %2666 }
0x2593   :  { %1825 = vrot.lane.b32.xlu0 %v2667_v29, %s2703_s7 }
0x2605   :  { %v1826_v30 = vpop.permute.xlu0 %1825 }
0x2606   :  { %v1828_v31 = vmul.f32 %v2665_v25, %v1826_v30 }
0x2608   :  { %1830 = vrot.lane.b32.xlu1 %v1828_v31, %s2704_s8 }
0x267a   :  { %v1831_v32 = vpop.permute.xlu1 %1830 }
0x267b   :  { %2411 = vmatmul.mubr.msk.f32.vlgmr.msra.gmra.mrb[18].mxu1 %vm36_vm0, %v1831_v32 }
0x274e   :  { %v1900_v34 = vpop.f32.mrb[18].mxu1 }
0x274f   :  { %v1904_v39 = vadd.f32 %v1900_v34, %v1131_v33  ;;  %v2412_v35 = vpop.f32.mrb[19].mxu1 }
0x2751   :  { %2668 = vtanh.f32 %v1904_v39  ;;  %v2085_v38 = vmul.f32 -1.442695, %v1904_v39 }
0x2753   :  { %2670 = vpow2.f32 %v2085_v38 }
0x275b   :  { %v2669_v36 = vpop.eup %2668 }
0x275c   :  { %1914 = vrot.lane.b32.xlu0 %v2669_v36, %s2703_s7 }
0x275d   :  { %v2671_v40 = vpop.eup %2670 }
0x275e   :  { %v1908_v44 = vadd.f32 1.0, %v2671_v40 }
0x2760   :  { %2672 = vrcp.f32 %v1908_v44 }
0x276a   :  { %v2673_v1 = vpop.eup %2672 }
0x276b   :  { %v1912_v47 = vmul.f32 %v2673_v1, %v1822_v61 }
0x27ce   :  { %v1915_v45 = vpop.permute.xlu0 %1914 }
0x27cf   :  { %v1917_v46 = vmul.f32 %v2673_v1, %v1915_v45 }
0x27d1   :  { %1919 = vrot.lane.b32.xlu1 %v1917_v46, %s2704_s8 }
0x2843   :  { %v1920_v48 = vpop.permute.xlu1 %1919 }
0x2844   :  { %v1922_v8 = vadd.f32 %v1920_v48, %v1912_v47 }
0x2846   :  { %2674 = vtanh.f32 %v1922_v8 }
0x2850   :  { %v2675_v53 = vpop.eup %2674 }
0x2851   :  { %1925 = vrot.lane.b32.xlu0 %v2675_v53, %s2703_s7  ;;  %s2676_s7 = scalar_lea.vmem %s2022_s22, 32 }
0x2852   :  { %p2677_p0 = scmp.ne.s32.totalorder %s2022_s22, %s2676_s7  ;;  %p2682_p2 = scmp.lt.s32.totalorder %s2676_s7, %s2676_s7 }
0x2854   :  { %p2683_p3 = por %p2682_p2, %p2681_p1 }
0x2856   :  { %p2684_p4 = pnand %p2683_p3, %p2677_p0 }
0x28c3   :  { %v1926_v54 = vpop.permute.xlu0 %1925 }
0x28c4   :  { %v1928_v43 = vmul.f32 %v2673_v1, %v1926_v54 }
0x28c6   :  { %1939 = vrot.lane.b32.xlu1 %v1928_v43, %s2704_s8 }
0x2938   :  { %v1940_v56 = vpop.permute.xlu1 %1939 }
0x2939   :  { %2422 = vmatmul.mubr.msk.f32.vlgmr.msra.gmra.mrb[28].mxu0 %vm36_vm0, %v1940_v56 }
0x2a0c   :  { %v2009_v60 = vpop.f32.mrb[28].mxu0 }
0x2a0d   :  { %v2010_v4 = vadd.f32 %v2086_v57, %v2009_v60  ;;  %v2423_v63 = vpop.f32.mrb[29].mxu0 }
0x2a0f   :  { %2014 = vst.msk [vmem:[#allocation3] sm:$0x3] %vm2013_vm2, %v2010_v4 }
0x2a10   :  { %2687 = shalt.err (!%p2684_p4)
}
0x2a11   :  { %s2688_s24 = scalar_lea.hbm %s3104_s3, 32 }
0x2a12   :  { %p2689_p5 = scmp.ne.s32.totalorder %s3104_s3, %s2688_s24  ;;  %p2692_p6 = scmp.lt.u32.totalorder %s2688_s24, %s3104_s3 }
0x2a14   :  { %p2694_p7 = pnand %p2692_p6, %p2689_p5 }
0x2a16   :  { %2697 = shalt.err (!%p2694_p7)
}
0x2a17   :  { %2024 = dma.vmem_to_hbm [thread:$0]  %s2022_s22, 32, %s3104_s3, [#allocation4]  }
0x2a18   :  { %2698 = dma.done.wait [#allocation4], 32  }
0x2a19   :  { %2699 = vsyncadd [#allocation4], 4294967264 }
0x2a1a   :  { %2028 = vsyncpa [#allocation4], 1 }

</bundles_post_ra>
